<compile_context>
chip_gen: v6e
topology: v6e:2x2x1
jax: 0.10.0
libtpu: 0.0.40
codegen_flags: <defaults>
</compile_context>

<pallas_src>
import jax
import jax.numpy as jnp
from jax import lax
from jax.experimental import pallas as pl
from jax.experimental.pallas import tpu as pltpu

IN_FEATURES = 64
HIDDEN = 16
OUT_FEATURES = 1


def _round_up(n, m):
    return ((n + m - 1) // m) * m


def _mlp_kernel(x_ref, w1_ref, b1_ref, w2_ref, b2_ref, o_ref):
    # F.relu(x): exact in any dtype -> no f32 round-trip casts.
    x = jnp.maximum(x_ref[...], 0)
    # Linear(64, 16) on the MXU with f32 accumulation; bias + ReLU on the VPU.
    h = jnp.dot(x, w1_ref[...], preferred_element_type=jnp.float32)
    h = jnp.maximum(h + b1_ref[...], 0.0)
    # Linear(16, 1) as a transposed dot: (1,16) @ (tb,16)^T -> (1, tb).
    # Lane-dense row result -> few stores instead of tb/8 masked column stores.
    y = lax.dot_general(
        w2_ref[...], h,
        dimension_numbers=(((1,), (1,)), ((), ())),
        preferred_element_type=jnp.float32,
    ) + b2_ref[...]
    o_ref[...] = y[None].astype(o_ref.dtype)


def example_global_module(x, w1, b1, w2, b2, *, block_rows=8192):
    """x: [B, 64] -> [B, 1].  w1: [64, 16], b1: [16], w2: [16, 1], b2: [1].

    x may be float32 or bfloat16.  No wrapper-side cast/pad is performed: to
    get the bf16 HBM-traffic saving, the producer must already hold x in bf16.
    """
    B, f_in = x.shape
    assert f_in == IN_FEATURES
    out_dtype = x.dtype

    # Tile the batch.  128-row granularity keeps sublanes aligned for every
    # input dtype and makes the lane-dense (1, tb) output row store cleanly.
    # Cap at 16384 rows so the double-buffered x block (<= 2 x 4 MiB f32) stays
    # inside the default scoped-VMEM limit on every generation (v5e: 16 MiB).
    block_rows = max(128, min(int(block_rows), 16384))
    n_tiles = pl.cdiv(B, block_rows)
    if n_tiles == 1 and B > 128:
        n_tiles = 2                       # give both v7x TensorCores a tile
    tb = _round_up(pl.cdiv(B, n_tiles), 128)
    n_tiles = pl.cdiv(B, tb)
    b_padded = n_tiles * tb               # handled by Pallas, NOT jnp.pad

    w1 = w1.astype(x.dtype)                               # (64, 16), tiny
    b1_2d = b1.reshape(1, HIDDEN).astype(jnp.float32)     # (1, 16)
    w2_row = w2.reshape(1, HIDDEN).astype(jnp.float32)    # (16, 1) -> (1, 16)
    b2_2d = b2.reshape(1, 1).astype(jnp.float32)          # (1, 1)

    param_bytes = (w1.size * w1.dtype.itemsize + b1_2d.size * 4
                   + w2_row.size * 4 + b2_2d.size * 4)
    cost = pl.CostEstimate(
        flops=2 * B * (IN_FEATURES * HIDDEN + HIDDEN),
        transcendentals=0,
        bytes_accessed=(B * IN_FEATURES * x.dtype.itemsize
                        + b_padded * OUT_FEATURES * jnp.dtype(out_dtype).itemsize
                        + param_bytes),
    )

    out = pl.pallas_call(
        _mlp_kernel,
        out_shape=jax.ShapeDtypeStruct((n_tiles, 1, tb), out_dtype),
        grid_spec=pltpu.PrefetchScalarGridSpec(
            num_scalar_prefetch=0,
            grid=(n_tiles,),
            in_specs=[
                pl.BlockSpec((tb, IN_FEATURES), lambda i: (i, 0)),      # streamed
                pl.BlockSpec((IN_FEATURES, HIDDEN), lambda i: (0, 0)),  # resident
                pl.BlockSpec((1, HIDDEN), lambda i: (0, 0)),            # resident
                pl.BlockSpec((1, HIDDEN), lambda i: (0, 0)),            # resident
                pl.BlockSpec((1, 1), lambda i: (0, 0)),                 # resident
            ],
            out_specs=pl.BlockSpec((1, 1, tb), lambda i: (i, 0, 0)),
        ),
        compiler_params=pltpu.CompilerParams(
            # Rows are independent -> shardable across v7x's 2 TensorCores.
            dimension_semantics=("parallel",),
        ),
        cost_estimate=cost,
    )(x, w1, b1_2d, w2_row, b2_2d)

    # (n_tiles, 1, tb) row-major is exactly batch order: free reshape + tiny
    # tail slice (<= 127 rows * 4 B) instead of a full pre-kernel pad pass.
    return out.reshape(b_padded, OUT_FEATURES)[:B]


def _reference(x, w1, b1, w2, b2):
    hp = lax.Precision.HIGHEST
    out = jnp.maximum(x, 0.0)
    out = jnp.maximum(jnp.dot(out, w1, precision=hp) + b1, 0.0)
    return jnp.dot(out, w2, precision=hp) + b2


if __name__ == "__main__":
    key = jax.random.PRNGKey(0)
    kx, kw1, kb1, kw2, kb2 = jax.random.split(key, 5)

    # Batch NOT a multiple of the tile: exercises >=2 tiles (megacore split)
    # plus the partial last block (no wrapper-side padding).
    B = 3000
    x = jax.random.normal(kx, (B, IN_FEATURES), dtype=jnp.float32)

    # Deterministic synthetic parameters, stored as [in, out]
    # (= transpose of PyTorch's [out, in] nn.Linear weight layout).
    w1 = jax.random.normal(kw1, (IN_FEATURES, HIDDEN), dtype=jnp.float32) * 0.1
    b1 = jax.random.normal(kb1, (HIDDEN,), dtype=jnp.float32) * 0.1
    w2 = jax.random.normal(kw2, (HIDDEN, OUT_FEATURES), dtype=jnp.float32) * 0.1
    b2 = jax.random.normal(kb2, (OUT_FEATURES,), dtype=jnp.float32) * 0.1

    ref = _reference(x, w1, b1, w2, b2)

    # f32 path (default large tiles).
    out = example_global_module(x, w1, b1, w2, b2)
    jax.block_until_ready(out)
    assert out.shape == (B, OUT_FEATURES)
    assert jnp.allclose(out, ref, atol=2e-3, rtol=2e-3)

    # bf16-input path: x already lives in bf16 (no wrapper cast), f32 accum.
    out_bf16 = example_global_module(x.astype(jnp.bfloat16), w1, b1, w2, b2)
    jax.block_until_ready(out_bf16)
    assert out_bf16.shape == (B, OUT_FEATURES)
    assert jnp.allclose(out_bf16.astype(jnp.float32), ref, atol=5e-2, rtol=5e-2)

    print("KERNEL_OK")
</pallas_src>

<mosaic_0001>
module attributes {stable_mosaic.version = 11 : i64} {
  func.func @_mlp_kernel(%arg0: i32, %arg1: memref<1536x64xf32, #tpu.memory_space<vmem>>, %arg2: memref<64x16xf32, #tpu.memory_space<vmem>>, %arg3: memref<1x16xf32, #tpu.memory_space<vmem>>, %arg4: memref<1x16xf32, #tpu.memory_space<vmem>>, %arg5: memref<1x1xf32, #tpu.memory_space<vmem>>, %arg6: memref<1x1x1536xf32, #tpu.memory_space<vmem>>) attributes {dimension_semantics = [#tpu.dimension_semantics<parallel>], iteration_bounds = array<i64: 2>, scalar_prefetch = 0 : i64, scratch_operands = 0 : i64, tpu.core_type = #tpu.core_type<tc>, window_params = [{transform_indices = @transform_0, window_bounds = array<i64: 1536, 64>}, {pipeline_mode = #tpu.pipeline_mode<synchronous>, transform_indices = @transform_1, window_bounds = array<i64: 64, 16>}, {pipeline_mode = #tpu.pipeline_mode<synchronous>, transform_indices = @transform_2, window_bounds = array<i64: 1, 16>}, {pipeline_mode = #tpu.pipeline_mode<synchronous>, transform_indices = @transform_3, window_bounds = array<i64: 1, 16>}, {pipeline_mode = #tpu.pipeline_mode<synchronous>, transform_indices = @transform_4, window_bounds = array<i64: 1, 1>}, {transform_indices = @transform_5, window_bounds = array<i64: 1, 1, 1536>}]} {
    %c0 = arith.constant 0 : index
    %c0_0 = arith.constant 0 : index
    %0 = vector.load %arg1[%c0, %c0_0] : memref<1536x64xf32, #tpu.memory_space<vmem>>, vector<1536x64xf32>
    %cst = arith.constant 0.000000e+00 : f32
    %1 = vector.broadcast %cst : f32 to vector<1536x64xf32>
    %2 = arith.maximumf %0, %1 : vector<1536x64xf32>
    %c0_1 = arith.constant 0 : index
    %c0_2 = arith.constant 0 : index
    %3 = vector.load %arg2[%c0_1, %c0_2] : memref<64x16xf32, #tpu.memory_space<vmem>>, vector<64x16xf32>
    %cst_3 = arith.constant dense<0.000000e+00> : vector<1536x16xf32>
    %4 = tpu.matmul %2, %3, %cst_3 {dimension_numbers = #tpu.dot_dimension_numbers<[1], [0], [0], [1], [0, 0, 1, 1], [], []>} : vector<1536x64xf32>, vector<64x16xf32>, vector<1536x16xf32> -> vector<1536x16xf32>
    %c0_4 = arith.constant 0 : index
    %c0_5 = arith.constant 0 : index
    %5 = vector.load %arg3[%c0_4, %c0_5] : memref<1x16xf32, #tpu.memory_space<vmem>>, vector<1x16xf32>
    %6 = vector.broadcast %5 : vector<1x16xf32> to vector<1536x16xf32>
    %7 = arith.addf %4, %6 : vector<1536x16xf32>
    %cst_6 = arith.constant 0.000000e+00 : f32
    %8 = vector.broadcast %cst_6 : f32 to vector<1536x16xf32>
    %9 = arith.maximumf %7, %8 : vector<1536x16xf32>
    %c0_7 = arith.constant 0 : index
    %c0_8 = arith.constant 0 : index
    %10 = vector.load %arg4[%c0_7, %c0_8] : memref<1x16xf32, #tpu.memory_space<vmem>>, vector<1x16xf32>
    %cst_9 = arith.constant dense<0.000000e+00> : vector<1x1536xf32>
    %11 = tpu.matmul %10, %9, %cst_9 {dimension_numbers = #tpu.dot_dimension_numbers<[1], [1], [0], [0], [0, 0, 1, 0], [], []>} : vector<1x16xf32>, vector<1536x16xf32>, vector<1x1536xf32> -> vector<1x1536xf32>
    %c0_10 = arith.constant 0 : index
    %c0_11 = arith.constant 0 : index
    %12 = vector.load %arg5[%c0_10, %c0_11] : memref<1x1xf32, #tpu.memory_space<vmem>>, vector<1x1xf32>
    %13 = vector.broadcast %12 : vector<1x1xf32> to vector<1x1536xf32>
    %14 = arith.addf %11, %13 : vector<1x1536xf32>
    %15 = vector.shape_cast %14 : vector<1x1536xf32> to vector<1x1x1536xf32>
    %c0_12 = arith.constant 0 : index
    %c0_13 = arith.constant 0 : index
    %c0_14 = arith.constant 0 : index
    %16 = vector.load %arg6[%c0_12, %c0_13, %c0_14] : memref<1x1x1536xf32, #tpu.memory_space<vmem>>, vector<1x1x1536xf32>
    tpu.vector_store %arg6[%c0_12, %c0_13, %c0_14], %15 {strides = array<i32>} : memref<1x1x1536xf32, #tpu.memory_space<vmem>>, vector<1x1x1536xf32>,
    return
  }
  func.func @transform_0(%arg0: i32) -> (i32, i32) {
    %c0_i32 = arith.constant 0 : i32
    %c0_i32_0 = arith.constant 0 : i32
    return %arg0, %c0_i32 : i32, i32
  }
  func.func @transform_1(%arg0: i32) -> (i32, i32) {
    %c0_i32 = arith.constant 0 : i32
    %c0_i32_0 = arith.constant 0 : i32
    %c0_i32_1 = arith.constant 0 : i32
    return %c0_i32, %c0_i32_0 : i32, i32
  }
  func.func @transform_2(%arg0: i32) -> (i32, i32) {
    %c0_i32 = arith.constant 0 : i32
    %c0_i32_0 = arith.constant 0 : i32
    %c0_i32_1 = arith.constant 0 : i32
    return %c0_i32, %c0_i32_0 : i32, i32
  }
  func.func @transform_3(%arg0: i32) -> (i32, i32) {
    %c0_i32 = arith.constant 0 : i32
    %c0_i32_0 = arith.constant 0 : i32
    %c0_i32_1 = arith.constant 0 : i32
    return %c0_i32, %c0_i32_0 : i32, i32
  }
  func.func @transform_4(%arg0: i32) -> (i32, i32) {
    %c0_i32 = arith.constant 0 : i32
    %c0_i32_0 = arith.constant 0 : i32
    %c0_i32_1 = arith.constant 0 : i32
    return %c0_i32, %c0_i32_0 : i32, i32
  }
  func.func @transform_5(%arg0: i32) -> (i32, i32, i32) {
    %c0_i32 = arith.constant 0 : i32
    %c0_i32_0 = arith.constant 0 : i32
    %c0_i32_1 = arith.constant 0 : i32
    return %arg0, %c0_i32, %c0_i32_0 : i32, i32, i32
  }
}

</mosaic_0001>

<bundles_post_ra>
// kernel: tpu_custom_call.1
= control target key start
LH: loop header
LB: loop body
LE: loop exit
PB: predicated region body
PF: predicated region fallthrough
CT: control target
= control target key end

     0   :  { %s6268_s0 = inlined_call_operand.vmem [shape: f32[3000,64], index: 0, kind: input, shape index: {}]   ;;  %s6269_s1 = inlined_call_operand.vmem [shape: f32[64,16], index: 1, kind: input, shape index: {}]   ;;  %s6270_s2 = inlined_call_operand.vmem [shape: f32[1,16], index: 2, kind: input, shape index: {}]   ;;  %s6271_s3 = inlined_call_operand.vmem [shape: f32[1,16], index: 3, kind: input, shape index: {}]   ;;  %s6272_s4 = inlined_call_operand.<no memory space> [shape: f32[1,1], index: 4, kind: input, shape index: {}]   ;;  %s6273_s5 = inlined_call_operand.hbm [shape: f32[2,1,1536], index: 5, kind: output, shape index: {}]  }
   0x1   :  { %v10_v0 = vstv %s6272_s4 }
   0x2   :  { %11 = vst [vmem:[#allocation2] sm:$0x1] %v10_v0 }
   0x3   :  { %12 = vsyncpa [#allocation4], 0 }
   0x4   :  { %14 = vsyncpa [#allocation4 + $0x1], 0  ;;  %s4875_s20 = smov 0   ;;  %s4877_s21 = smov 0  }
   0x5   :  { %s4879_s22 = smov 0   ;;  %s4881_s23 = smov 0  }
   0x6 LB: > { %s3623_s4 = sadd.s32 4294967295, %s4837_s23   ;;  %s3624_s24 = sadd.s32 4294967294, %s4837_s23   ;;  %s4837_s23 = sphi %s4881_s23, %s6279_s23   ;;  %s4833_s22 = sphi %s4879_s22, %s6278_s22   ;;  %s4829_s21 = sphi %s4877_s21, %s6277_s21   ;;  %s4825_s20 = sphi %s4875_s20, %s6276_s20  }
   0x7   : > { %s4898_s25 = sadd.s32 1, %s4837_s23   ;;  %s137_s26 = sadd.s32 1, %s4833_s22 }
   0x8   : > { %s134_s27 = ssub.s32 %s4837_s23, %s4898_s25  ;;  %p147_p0 = scmp.ne.s32.totalorder %s4833_s22, %s4829_s21 }
   0x9   : > { %p135_p1 = scmp.eq.s32.totalorder %s134_s27, 0  ;;  %p148_p2 = scmp.eq.s32.totalorder %s3623_s4, 1 }
   0xa   : > { %p153_p3 = scmp.ne.s32.totalorder %s4829_s21, %s4825_s20  ;;  %p154_p4 = scmp.eq.s32.totalorder %s3624_s24, 1 }
   0xb   : > { %s4908_s28 = scalar_select %p135_p1, %s4833_s22, %s137_s26  }
   0xc   : > { %p4910_p5 = por %p148_p2, %p147_p0  ;;  %p4914_p6 = por %p154_p4, %p153_p3 }
   0xd   : > { %p3627_p7 = scmp.ge.s32.totalorder %s4837_s23, 1  ;;  %p201_p8 = scmp.lt.s32.totalorder %s4837_s23, 3 }
   0xf   : > { %p202_p9 = pnand %p3627_p7, %p201_p8 }
  0x10   : > { %s4926_s10 = smul.u32 (!%p202_p9), 192, %s3623_s4  ;;  %s230_s19 = sand.u32 (!%p202_p9), 1, %s4829_s21  }
  0x11   : > { %205 = sbr.rel (%p202_p9) target bundleno = 898 (0x382), region = 40  ;;  %s3551_s8 = scalar_lea.sflag (!%p202_p9), [#allocation4], %s230_s19 }
  0x12   : > { %p238_p10 = scmp.lt.s32.totalorder (!%p202_p9), %s4926_s10, 374  ;;  %s4731_s4 = smul.u32 (!%p202_p9), 12, %s230_s19 }
  0x13   : > { %s3563_s7 = scalar_lea.hbm (!%p202_p9), %s6273_s5, %s4926_s10  ;;  %s4841_s11 = smov (!%p202_p9), [#allocation3]  }
  0x14   : > { %s4781_s12 = sshll.u32 (!%p202_p9), %s4841_s11, 4  ;;  %s4782_s12 = int_to_ptr.vmem [resolvable:$false] %s4781_s12 }
  0x15   : > { %s4783_s13 = scalar_lea.vmem (!%p202_p9), %s4782_s12, 384 }
  0x16   : > { %v638_v1 = vld [vmem:[%s6269_s1 + $0x38] sm:$0xff]  ;;  %v637_v2 = vld [vmem:[%s6269_s1 + $0x30] sm:$0xff]  ;;  %v636_v3 = vld [vmem:[%s6269_s1 + $0x28] sm:$0xff]  ;;  %s239_s15 = scalar_select %p238_p10, %s4926_s10, 374  ;;  %vm646_vm0 = vcmask 523264   ;;  %vm2451_vm1 = vcmask 130048  }
  0x17   : > { %4427 = vmatprep.subr.mxu0 %v638_v1  ;;  %v635_v4 = vld [vmem:[%s6269_s1 + $0x20] sm:$0xff]  ;;  %v634_v5 = vld [vmem:[%s6269_s1 + $0x18] sm:$0xff]  ;;  %v633_v6 = vld [vmem:[%s6269_s1 + $0x10] sm:$0xff] }
  0x18   : > { %4428 = vmatpush3.msra.mxu0 %v638_v1  ;;  %s3628_s18 = sshll.u32 %s239_s15, 3  ;;  %v632_v9 = vld [vmem:[%s6269_s1 + $0x8] sm:$0xff]  ;;  %v631_v12 = vld [vmem:[%s6269_s1] sm:$0xff] }
  0x19   : > { %4429 = vmatprep.subr.mxu0 %v637_v2  ;;  %s4942_s24 = scalar_lea.vmem %s6268_s0, %s3628_s18 }
  0x1a   : > { %4430 = vmatpush3.msra.mxu0 %v637_v2  ;;  %v247_v7 = vld [vmem:[%s4942_s24] sm:$0xff]  ;;  %v248_v10 = vld [vmem:[%s4942_s24 + $0x8] sm:$0xff]  ;;  %v249_v11 = vld [vmem:[%s4942_s24 + $0x10] sm:$0xff] }
  0x1b   : > { %4431 = vmatprep.subr.mxu0 %v636_v3  ;;  %v439_v8 = vmax.f32 %v247_v7, 0.0  ;;  %v440_v13 = vmax.f32 %v248_v10, 0.0  ;;  %v441_v14 = vmax.f32 %v249_v11, 0.0  ;;  %v250_v15 = vld [vmem:[%s4942_s24 + $0x18] sm:$0xff]  ;;  %v251_v16 = vld [vmem:[%s4942_s24 + $0x20] sm:$0xff]  ;;  %v252_v19 = vld [vmem:[%s4942_s24 + $0x28] sm:$0xff] }
  0x1c   : > { %4432 = vmatpush3.msra.mxu0 %v636_v3  ;;  %v442_v17 = vmax.f32 %v250_v15, 0.0  ;;  %v443_v18 = vmax.f32 %v251_v16, 0.0  ;;  %v253_v20 = vld [vmem:[%s4942_s24 + $0x30] sm:$0xff]  ;;  %v444_v21 = vmax.f32 %v252_v19, 0.0  ;;  %v254_v23 = vld [vmem:[%s4942_s24 + $0x38] sm:$0xff]  ;;  %v255_v24 = vld [vmem:[%s4942_s24 + $0x40] sm:$0xff] }
  0x1d   : > { %4433 = vmatprep.subr.mxu0 %v635_v4  ;;  %4443 = vmatprep.mubr.msk.f32.mxu0 %vm646_vm0, %v439_v8  ;;  %v445_v22 = vmax.f32 %v253_v20, 0.0  ;;  %v446_v25 = vmax.f32 %v254_v23, 0.0  ;;  %v447_v26 = vmax.f32 %v255_v24, 0.0  ;;  %v256_v27 = vld [vmem:[%s4942_s24 + $0x48] sm:$0xff]  ;;  %v257_v28 = vld [vmem:[%s4942_s24 + $0x50] sm:$0xff]  ;;  %v258_v31 = vld [vmem:[%s4942_s24 + $0x58] sm:$0xff] }
  0x1e   : > { %4434 = vmatpush3.msra.mxu0 %v635_v4  ;;  %v448_v29 = vmax.f32 %v256_v27, 0.0  ;;  %v449_v30 = vmax.f32 %v257_v28, 0.0  ;;  %v259_v32 = vld [vmem:[%s4942_s24 + $0x60] sm:$0xff]  ;;  %v450_v33 = vmax.f32 %v258_v31, 0.0  ;;  %v260_v35 = vld [vmem:[%s4942_s24 + $0x68] sm:$0xff]  ;;  %v261_v36 = vld [vmem:[%s4942_s24 + $0x70] sm:$0xff] }
  0x1f   : > { %4435 = vmatprep.subr.mxu0 %v634_v5  ;;  %v451_v34 = vmax.f32 %v259_v32, 0.0  ;;  %v452_v37 = vmax.f32 %v260_v35, 0.0  ;;  %v453_v38 = vmax.f32 %v261_v36, 0.0  ;;  %v262_v39 = vld [vmem:[%s4942_s24 + $0x78] sm:$0xff]  ;;  %v263_v40 = vld [vmem:[%s4942_s24 + $0x80] sm:$0xff]  ;;  %v264_v43 = vld [vmem:[%s4942_s24 + $0x88] sm:$0xff] }
  0x20   : > { %4436 = vmatpush3.msra.mxu0 %v634_v5  ;;  %v454_v41 = vmax.f32 %v262_v39, 0.0  ;;  %v455_v42 = vmax.f32 %v263_v40, 0.0  ;;  %v265_v44 = vld [vmem:[%s4942_s24 + $0x90] sm:$0xff]  ;;  %v456_v45 = vmax.f32 %v264_v43, 0.0  ;;  %v266_v47 = vld [vmem:[%s4942_s24 + $0x98] sm:$0xff]  ;;  %v267_v48 = vld [vmem:[%s4942_s24 + $0xa0] sm:$0xff] }
  0x21   : > { %4437 = vmatprep.subr.mxu0 %v633_v6  ;;  %v457_v46 = vmax.f32 %v265_v44, 0.0  ;;  %v458_v49 = vmax.f32 %v266_v47, 0.0  ;;  %v459_v50 = vmax.f32 %v267_v48, 0.0  ;;  %v268_v51 = vld [vmem:[%s4942_s24 + $0xa8] sm:$0xff]  ;;  %v269_v52 = vld [vmem:[%s4942_s24 + $0xb0] sm:$0xff]  ;;  %v270_v55 = vld [vmem:[%s4942_s24 + $0xb8] sm:$0xff] }
  0x22   : > { %4438 = vmatpush3.msra.mxu0 %v633_v6  ;;  %v460_v53 = vmax.f32 %v268_v51, 0.0  ;;  %v461_v54 = vmax.f32 %v269_v52, 0.0  ;;  %v271_v56 = vld [vmem:[%s4942_s24 + $0xc0] sm:$0xff]  ;;  %v462_v57 = vmax.f32 %v270_v55, 0.0  ;;  %v272_v59 = vld [vmem:[%s4942_s24 + $0xc8] sm:$0xff]  ;;  %v273_v60 = vld [vmem:[%s4942_s24 + $0xd0] sm:$0xff] }
  0x23   : > { %4439 = vmatprep.subr.mxu0 %v632_v9  ;;  %v463_v58 = vmax.f32 %v271_v56, 0.0  ;;  %v464_v61 = vmax.f32 %v272_v59, 0.0  ;;  %v465_v62 = vmax.f32 %v273_v60, 0.0  ;;  %v274_v63 = vld [vmem:[%s4942_s24 + $0xd8] sm:$0xff]  ;;  %v275_v0 = vld [vmem:[%s4942_s24 + $0xe0] sm:$0xff]  ;;  %v276_v3 = vld [vmem:[%s4942_s24 + $0xe8] sm:$0xff] }
  0x24   : > { %4440 = vmatpush3.msra.mxu0 %v632_v9  ;;  %v466_v1 = vmax.f32 %v274_v63, 0.0  ;;  %v467_v2 = vmax.f32 %v275_v0, 0.0  ;;  %v277_v4 = vld [vmem:[%s4942_s24 + $0xf0] sm:$0xff]  ;;  %v468_v5 = vmax.f32 %v276_v3, 0.0  ;;  %v278_v7 = vld [vmem:[%s4942_s24 + $0xf8] sm:$0xff]  ;;  %v279_v8 = vld [vmem:[%s4942_s24 + $0x100] sm:$0xff] }
  0x25   : > { %4441 = vmatprep.subr.mxu0 %v631_v12  ;;  %v469_v6 = vmax.f32 %v277_v4, 0.0  ;;  %v470_v9 = vmax.f32 %v278_v7, 0.0  ;;  %v471_v10 = vmax.f32 %v279_v8, 0.0  ;;  %v280_v11 = vld [vmem:[%s4942_s24 + $0x108] sm:$0xff]  ;;  %v282_v15 = vld [vmem:[%s4942_s24 + $0x118] sm:$0xff]  ;;  %v283_v16 = vld [vmem:[%s4942_s24 + $0x120] sm:$0xff] }
  0x26   : > { %4442 = vmatpush3.msra.mxu0 %v631_v12  ;;  %v281_v12 = vld [vmem:[%s4942_s24 + $0x110] sm:$0xff]  ;;  %v284_v19 = vld [vmem:[%s4942_s24 + $0x128] sm:$0xff]  ;;  %v286_v23 = vld [vmem:[%s4942_s24 + $0x138] sm:$0xff] }
  0x27   : > { %4444 = vmatmul.mubr.msk.f32.vlgmr.msra.gmra.mxu0 %vm646_vm0, %v440_v13  ;;  %v472_v13 = vmax.f32 %v280_v11, 0.0  ;;  %v285_v20 = vld [vmem:[%s4942_s24 + $0x130] sm:$0xff]  ;;  %v287_v24 = vld [vmem:[%s4942_s24 + $0x140] sm:$0xff]  ;;  %v288_v27 = vld [vmem:[%s4942_s24 + $0x148] sm:$0xff] }
  0x28   : > { %4446 = vmatprep.mubr.msk.f32.mxu0 %vm646_vm0, %v441_v14  ;;  %v473_v14 = vmax.f32 %v281_v12, 0.0  ;;  %v289_v28 = vld [vmem:[%s4942_s24 + $0x150] sm:$0xff]  ;;  %v290_v31 = vld [vmem:[%s4942_s24 + $0x158] sm:$0xff]  ;;  %v291_v32 = vld [vmem:[%s4942_s24 + $0x160] sm:$0xff] }
  0x29   : > { %v292_v35 = vld [vmem:[%s4942_s24 + $0x168] sm:$0xff]  ;;  %v293_v36 = vld [vmem:[%s4942_s24 + $0x170] sm:$0xff]  ;;  %v294_v39 = vld [vmem:[%s4942_s24 + $0x178] sm:$0xff] }
  0x2a   : > { %v295_v40 = vld [vmem:[%s4942_s24 + $0x180] sm:$0xff]  ;;  %v296_v43 = vld [vmem:[%s4942_s24 + $0x188] sm:$0xff]  ;;  %v297_v44 = vld [vmem:[%s4942_s24 + $0x190] sm:$0xff] }
  0x2b   : > { %4447 = vmatmul.mubr.msk.f32.gmra.mxu0 %vm646_vm0, %v442_v17  ;;  %v474_v17 = vmax.f32 %v282_v15, 0.0  ;;  %v298_v47 = vld [vmem:[%s4942_s24 + $0x198] sm:$0xff]  ;;  %v299_v48 = vld [vmem:[%s4942_s24 + $0x1a0] sm:$0xff]  ;;  %v300_v51 = vld [vmem:[%s4942_s24 + $0x1a8] sm:$0xff] }
  0x2c   : > { %4449 = vmatprep.mubr.msk.f32.mxu0 %vm646_vm0, %v443_v18  ;;  %v475_v18 = vmax.f32 %v283_v16, 0.0  ;;  %v301_v52 = vld [vmem:[%s4942_s24 + $0x1b0] sm:$0xff]  ;;  %v302_v55 = vld [vmem:[%s4942_s24 + $0x1b8] sm:$0xff]  ;;  %v303_v56 = vld [vmem:[%s4942_s24 + $0x1c0] sm:$0xff] }
  0x2d   : > { %v304_v59 = vld [vmem:[%s4942_s24 + $0x1c8] sm:$0xff]  ;;  %v305_v60 = vld [vmem:[%s4942_s24 + $0x1d0] sm:$0xff]  ;;  %v306_v63 = vld [vmem:[%s4942_s24 + $0x1d8] sm:$0xff] }
  0x2e   : > { %v307_v0 = vld [vmem:[%s4942_s24 + $0x1e0] sm:$0xff]  ;;  %v308_v3 = vld [vmem:[%s4942_s24 + $0x1e8] sm:$0xff]  ;;  %v309_v4 = vld [vmem:[%s4942_s24 + $0x1f0] sm:$0xff] }
  0x2f   : > { %4450 = vmatmul.mubr.msk.f32.gmra.mxu0 %vm646_vm0, %v444_v21  ;;  %v476_v21 = vmax.f32 %v284_v19, 0.0  ;;  %v310_v7 = vld [vmem:[%s4942_s24 + $0x1f8] sm:$0xff]  ;;  %v311_v8 = vld [vmem:[%s4942_s24 + $0x200] sm:$0xff]  ;;  %v312_v11 = vld [vmem:[%s4942_s24 + $0x208] sm:$0xff] }
  0x30   : > { %4452 = vmatprep.mubr.msk.f32.mxu0 %vm646_vm0, %v445_v22  ;;  %v477_v22 = vmax.f32 %v285_v20, 0.0  ;;  %v313_v12 = vld [vmem:[%s4942_s24 + $0x210] sm:$0xff]  ;;  %v314_v15 = vld [vmem:[%s4942_s24 + $0x218] sm:$0xff]  ;;  %v315_v16 = vld [vmem:[%s4942_s24 + $0x220] sm:$0xff] }
  0x31   : > { %v316_v19 = vld [vmem:[%s4942_s24 + $0x228] sm:$0xff]  ;;  %v317_v20 = vld [vmem:[%s4942_s24 + $0x230] sm:$0xff] }
  0x33   : > { %4453 = vmatmul.mubr.msk.f32.gmra.mxu0 %vm646_vm0, %v446_v25  ;;  %v478_v25 = vmax.f32 %v286_v23, 0.0  ;;  %v318_v23 = vld [vmem:[%s4942_s24 + $0x238] sm:$0xff] }
  0x34   : > { %4455 = vmatprep.mubr.msk.f32.mxu0 %vm646_vm0, %v447_v26  ;;  %v479_v26 = vmax.f32 %v287_v24, 0.0  ;;  %v319_v24 = vld [vmem:[%s4942_s24 + $0x240] sm:$0xff] }
  0x37   : > { %4456 = vmatmul.mubr.msk.f32.gmra.mxu0 %vm646_vm0, %v448_v29  ;;  %v480_v29 = vmax.f32 %v288_v27, 0.0  ;;  %v320_v27 = vld [vmem:[%s4942_s24 + $0x248] sm:$0xff] }
  0x38   : > { %4458 = vmatprep.mubr.msk.f32.mxu0 %vm646_vm0, %v449_v30  ;;  %v481_v30 = vmax.f32 %v289_v28, 0.0  ;;  %v321_v28 = vld [vmem:[%s4942_s24 + $0x250] sm:$0xff] }
  0x3b   : > { %4459 = vmatmul.mubr.msk.f32.gmra.mxu0 %vm646_vm0, %v450_v33  ;;  %v482_v33 = vmax.f32 %v290_v31, 0.0  ;;  %v322_v31 = vld [vmem:[%s4942_s24 + $0x258] sm:$0xff] }
  0x3c   : > { %4461 = vmatprep.mubr.msk.f32.mxu0 %vm646_vm0, %v451_v34  ;;  %v483_v34 = vmax.f32 %v291_v32, 0.0  ;;  %v323_v32 = vld [vmem:[%s4942_s24 + $0x260] sm:$0xff] }
  0x3f   : > { %4462 = vmatmul.mubr.msk.f32.gmra.mxu0 %vm646_vm0, %v452_v37  ;;  %v484_v37 = vmax.f32 %v292_v35, 0.0  ;;  %v324_v35 = vld [vmem:[%s4942_s24 + $0x268] sm:$0xff] }
  0x40   : > { %4464 = vmatprep.mubr.msk.f32.mxu0 %vm646_vm0, %v453_v38  ;;  %v485_v38 = vmax.f32 %v293_v36, 0.0  ;;  %v325_v36 = vld [vmem:[%s4942_s24 + $0x270] sm:$0xff] }
  0x43   : > { %4465 = vmatmul.mubr.msk.f32.gmra.mxu0 %vm646_vm0, %v454_v41  ;;  %v486_v41 = vmax.f32 %v294_v39, 0.0  ;;  %v326_v39 = vld [vmem:[%s4942_s24 + $0x278] sm:$0xff] }
  0x44   : > { %4467 = vmatprep.mubr.msk.f32.mxu0 %vm646_vm0, %v455_v42  ;;  %v487_v42 = vmax.f32 %v295_v40, 0.0  ;;  %v327_v40 = vld [vmem:[%s4942_s24 + $0x280] sm:$0xff] }
  0x47   : > { %4468 = vmatmul.mubr.msk.f32.gmra.mxu0 %vm646_vm0, %v456_v45  ;;  %v488_v45 = vmax.f32 %v296_v43, 0.0  ;;  %v328_v43 = vld [vmem:[%s4942_s24 + $0x288] sm:$0xff] }
  0x48   : > { %4470 = vmatprep.mubr.msk.f32.mxu0 %vm646_vm0, %v457_v46  ;;  %v489_v46 = vmax.f32 %v297_v44, 0.0  ;;  %v329_v44 = vld [vmem:[%s4942_s24 + $0x290] sm:$0xff] }
  0x4b   : > { %4471 = vmatmul.mubr.msk.f32.gmra.mxu0 %vm646_vm0, %v458_v49  ;;  %v490_v49 = vmax.f32 %v298_v47, 0.0  ;;  %v330_v47 = vld [vmem:[%s4942_s24 + $0x298] sm:$0xff] }
  0x4c   : > { %4473 = vmatprep.mubr.msk.f32.mxu0 %vm646_vm0, %v459_v50  ;;  %v491_v50 = vmax.f32 %v299_v48, 0.0  ;;  %v331_v48 = vld [vmem:[%s4942_s24 + $0x2a0] sm:$0xff] }
  0x4f   : > { %4474 = vmatmul.mubr.msk.f32.gmra.mxu0 %vm646_vm0, %v460_v53  ;;  %v492_v53 = vmax.f32 %v300_v51, 0.0  ;;  %v332_v51 = vld [vmem:[%s4942_s24 + $0x2a8] sm:$0xff] }
  0x50   : > { %4476 = vmatprep.mubr.msk.f32.mxu0 %vm646_vm0, %v461_v54  ;;  %v493_v54 = vmax.f32 %v301_v52, 0.0  ;;  %v333_v52 = vld [vmem:[%s4942_s24 + $0x2b0] sm:$0xff] }
  0x53   : > { %4477 = vmatmul.mubr.msk.f32.gmra.mxu0 %vm646_vm0, %v462_v57  ;;  %v494_v57 = vmax.f32 %v302_v55, 0.0  ;;  %v334_v55 = vld [vmem:[%s4942_s24 + $0x2b8] sm:$0xff] }
  0x54   : > { %4479 = vmatprep.mubr.msk.f32.mxu0 %vm646_vm0, %v463_v58  ;;  %v495_v58 = vmax.f32 %v303_v56, 0.0  ;;  %v335_v56 = vld [vmem:[%s4942_s24 + $0x2c0] sm:$0xff] }
  0x57   : > { %4480 = vmatmul.mubr.msk.f32.gmra.mxu0 %vm646_vm0, %v464_v61  ;;  %v496_v61 = vmax.f32 %v304_v59, 0.0  ;;  %v336_v59 = vld [vmem:[%s4942_s24 + $0x2c8] sm:$0xff] }
  0x58   : > { %4482 = vmatprep.mubr.msk.f32.mxu0 %vm646_vm0, %v465_v62  ;;  %v497_v62 = vmax.f32 %v305_v60, 0.0  ;;  %v337_v60 = vld [vmem:[%s4942_s24 + $0x2d0] sm:$0xff] }
  0x5b   : > { %4483 = vmatmul.mubr.msk.f32.gmra.mxu0 %vm646_vm0, %v466_v1  ;;  %v498_v1 = vmax.f32 %v306_v63, 0.0  ;;  %v338_v63 = vld [vmem:[%s4942_s24 + $0x2d8] sm:$0xff] }
  0x5c   : > { %4485 = vmatprep.mubr.msk.f32.mxu0 %vm646_vm0, %v467_v2  ;;  %v499_v2 = vmax.f32 %v307_v0, 0.0  ;;  %v339_v0 = vld [vmem:[%s4942_s24 + $0x2e0] sm:$0xff] }
  0x5f   : > { %4486 = vmatmul.mubr.msk.f32.gmra.mxu0 %vm646_vm0, %v468_v5  ;;  %v500_v5 = vmax.f32 %v308_v3, 0.0  ;;  %v340_v3 = vld [vmem:[%s4942_s24 + $0x2e8] sm:$0xff] }
  0x60   : > { %4488 = vmatprep.mubr.msk.f32.mxu0 %vm646_vm0, %v469_v6  ;;  %v501_v6 = vmax.f32 %v309_v4, 0.0  ;;  %v341_v4 = vld [vmem:[%s4942_s24 + $0x2f0] sm:$0xff] }
  0x63   : > { %4489 = vmatmul.mubr.msk.f32.gmra.mxu0 %vm646_vm0, %v470_v9  ;;  %v502_v9 = vmax.f32 %v310_v7, 0.0  ;;  %v342_v7 = vld [vmem:[%s4942_s24 + $0x2f8] sm:$0xff] }
  0x64   : > { %4491 = vmatprep.mubr.msk.f32.mxu0 %vm646_vm0, %v471_v10  ;;  %v503_v10 = vmax.f32 %v311_v8, 0.0  ;;  %v343_v8 = vld [vmem:[%s4942_s24 + $0x300] sm:$0xff] }
  0x67   : > { %4492 = vmatmul.mubr.msk.f32.gmra.mxu0 %vm646_vm0, %v472_v13  ;;  %v504_v13 = vmax.f32 %v312_v11, 0.0  ;;  %v344_v11 = vld [vmem:[%s4942_s24 + $0x308] sm:$0xff] }
  0x68   : > { %4494 = vmatprep.mubr.msk.f32.mxu0 %vm646_vm0, %v473_v14  ;;  %v505_v14 = vmax.f32 %v313_v12, 0.0  ;;  %v345_v12 = vld [vmem:[%s4942_s24 + $0x310] sm:$0xff] }
  0x6b   : > { %4495 = vmatmul.mubr.msk.f32.gmra.mxu0 %vm646_vm0, %v474_v17  ;;  %v506_v17 = vmax.f32 %v314_v15, 0.0  ;;  %v346_v15 = vld [vmem:[%s4942_s24 + $0x318] sm:$0xff] }
  0x6c   : > { %4497 = vmatprep.mubr.msk.f32.mxu0 %vm646_vm0, %v475_v18  ;;  %v507_v18 = vmax.f32 %v315_v16, 0.0  ;;  %v347_v16 = vld [vmem:[%s4942_s24 + $0x320] sm:$0xff] }
  0x6f   : > { %4498 = vmatmul.mubr.msk.f32.gmra.mxu0 %vm646_vm0, %v476_v21  ;;  %v508_v21 = vmax.f32 %v316_v19, 0.0  ;;  %v538_v19 = vmax.f32 %v346_v15, 0.0 }
  0x70   : > { %4500 = vmatprep.mubr.msk.f32.mxu0 %vm646_vm0, %v477_v22  ;;  %v509_v22 = vmax.f32 %v317_v20, 0.0  ;;  %v539_v20 = vmax.f32 %v347_v16, 0.0 }
  0x73   : > { %4501 = vmatmul.mubr.msk.f32.gmra.mxu0 %vm646_vm0, %v478_v25  ;;  %v510_v25 = vmax.f32 %v318_v23, 0.0  ;;  %v349_v23 = vld [vmem:[%s4942_s24 + $0x330] sm:$0xff] }
  0x74   : > { %4503 = vmatprep.mubr.msk.f32.mxu0 %vm646_vm0, %v479_v26  ;;  %v511_v26 = vmax.f32 %v319_v24, 0.0 }
  0x77   : > { %4504 = vmatmul.mubr.msk.f32.gmra.mxu0 %vm646_vm0, %v480_v29  ;;  %v512_v29 = vmax.f32 %v320_v27, 0.0  ;;  %v350_v27 = vld [vmem:[%s4942_s24 + $0x338] sm:$0xff] }
  0x78   : > { %4506 = vmatprep.mubr.msk.f32.mxu0 %vm646_vm0, %v481_v30  ;;  %v513_v30 = vmax.f32 %v321_v28, 0.0 }
  0x7b   : > { %4507 = vmatmul.mubr.msk.f32.gmra.mxu0 %vm646_vm0, %v482_v33  ;;  %v514_v33 = vmax.f32 %v322_v31, 0.0  ;;  %v542_v31 = vmax.f32 %v350_v27, 0.0  ;;  %v370_v27 = vld [vmem:[%s4942_s24 + $0x3d8] sm:$0xff] }
  0x7c   : > { %4509 = vmatprep.mubr.msk.f32.mxu0 %vm646_vm0, %v483_v34  ;;  %v515_v34 = vmax.f32 %v323_v32, 0.0 }
  0x7f   : > { %4510 = vmatmul.mubr.msk.f32.gmra.mxu0 %vm646_vm0, %v484_v37  ;;  %v516_v37 = vmax.f32 %v324_v35, 0.0  ;;  %v353_v35 = vld [vmem:[%s4942_s24 + $0x350] sm:$0xff] }
  0x80   : > { %4512 = vmatprep.mubr.msk.f32.mxu0 %vm646_vm0, %v485_v38  ;;  %v517_v38 = vmax.f32 %v325_v36, 0.0 }
  0x83   : > { %4513 = vmatmul.mubr.msk.f32.gmra.mxu0 %vm646_vm0, %v486_v41  ;;  %v518_v41 = vmax.f32 %v326_v39, 0.0  ;;  %v354_v39 = vld [vmem:[%s4942_s24 + $0x358] sm:$0xff] }
  0x84   : > { %4515 = vmatprep.mubr.msk.f32.mxu0 %vm646_vm0, %v487_v42  ;;  %v519_v42 = vmax.f32 %v327_v40, 0.0 }
  0x87   : > { %4516 = vmatmul.mubr.msk.f32.gmra.mxu0 %vm646_vm0, %v488_v45  ;;  %v520_v45 = vmax.f32 %v328_v43, 0.0  ;;  %v546_v43 = vmax.f32 %v354_v39, 0.0  ;;  %v373_v39 = vld [vmem:[%s4942_s24 + $0x3f0] sm:$0xff] }
  0x88   : > { %4518 = vmatprep.mubr.msk.f32.mxu0 %vm646_vm0, %v489_v46  ;;  %v521_v46 = vmax.f32 %v329_v44, 0.0 }
  0x8b   : > { %4519 = vmatmul.mubr.msk.f32.gmra.mxu0 %vm646_vm0, %v490_v49  ;;  %v522_v49 = vmax.f32 %v330_v47, 0.0  ;;  %v357_v47 = vld [vmem:[%s4942_s24 + $0x370] sm:$0xff] }
  0x8c   : > { %4521 = vmatprep.mubr.msk.f32.mxu0 %vm646_vm0, %v491_v50  ;;  %v523_v50 = vmax.f32 %v331_v48, 0.0 }
  0x8f   : > { %4522 = vmatmul.mubr.msk.f32.gmra.mxu0 %vm646_vm0, %v492_v53  ;;  %v524_v53 = vmax.f32 %v332_v51, 0.0  ;;  %v358_v51 = vld [vmem:[%s4942_s24 + $0x378] sm:$0xff] }
  0x90   : > { %4524 = vmatprep.mubr.msk.f32.mxu0 %vm646_vm0, %v493_v54  ;;  %v525_v54 = vmax.f32 %v333_v52, 0.0 }
  0x93   : > { %4525 = vmatmul.mubr.msk.f32.gmra.mxu0 %vm646_vm0, %v494_v57  ;;  %v526_v57 = vmax.f32 %v334_v55, 0.0  ;;  %v550_v55 = vmax.f32 %v358_v51, 0.0 }
  0x94   : > { %4527 = vmatprep.mubr.msk.f32.mxu0 %vm646_vm0, %v495_v58  ;;  %v527_v58 = vmax.f32 %v335_v56, 0.0 }
  0x97   : > { %4528 = vmatmul.mubr.msk.f32.gmra.mxu0 %vm646_vm0, %v496_v61  ;;  %v528_v61 = vmax.f32 %v336_v59, 0.0  ;;  %v361_v59 = vld [vmem:[%s4942_s24 + $0x390] sm:$0xff] }
  0x98   : > { %4530 = vmatprep.mubr.msk.f32.mxu0 %vm646_vm0, %v497_v62  ;;  %v529_v62 = vmax.f32 %v337_v60, 0.0 }
  0x9b   : > { %4531 = vmatmul.mubr.msk.f32.gmra.mxu0 %vm646_vm0, %v498_v1  ;;  %v530_v1 = vmax.f32 %v338_v63, 0.0  ;;  %v362_v63 = vld [vmem:[%s4942_s24 + $0x398] sm:$0xff] }
  0x9c   : > { %4533 = vmatprep.mubr.msk.f32.mxu0 %vm646_vm0, %v499_v2  ;;  %v531_v2 = vmax.f32 %v339_v0, 0.0 }
  0x9f   : > { %4534 = vmatmul.mubr.msk.f32.gmra.mxu0 %vm646_vm0, %v500_v5  ;;  %v532_v5 = vmax.f32 %v340_v3, 0.0  ;;  %v554_v3 = vmax.f32 %v362_v63, 0.0 }
  0xa0   : > { %4536 = vmatprep.mubr.msk.f32.mxu0 %vm646_vm0, %v501_v6  ;;  %v533_v6 = vmax.f32 %v341_v4, 0.0 }
  0xa3   : > { %4537 = vmatmul.mubr.msk.f32.gmra.mxu0 %vm646_vm0, %v502_v9  ;;  %v534_v9 = vmax.f32 %v342_v7, 0.0  ;;  %v365_v7 = vld [vmem:[%s4942_s24 + $0x3b0] sm:$0xff] }
  0xa4   : > { %4539 = vmatprep.mubr.msk.f32.mxu0 %vm646_vm0, %v503_v10  ;;  %v535_v10 = vmax.f32 %v343_v8, 0.0 }
  0xa7   : > { %4540 = vmatmul.mubr.msk.f32.gmra.mxu0 %vm646_vm0, %v504_v13  ;;  %v536_v13 = vmax.f32 %v344_v11, 0.0  ;;  %v366_v11 = vld [vmem:[%s4942_s24 + $0x3b8] sm:$0xff] }
  0xa8   : > { %4542 = vmatprep.mubr.msk.f32.mxu0 %vm646_vm0, %v505_v14  ;;  %v537_v14 = vmax.f32 %v345_v12, 0.0  ;;  %v558_v15 = vmax.f32 %v366_v11, 0.0 }
  0xab   : > { %4543 = vmatmul.mubr.msk.f32.gmra.mxu0 %vm646_vm0, %v506_v17  ;;  %v5154_v17 = vld [vmem:[%s6271_s3] sm:$0x1] }
  0xac   : > { %4545 = vmatprep.mubr.msk.f32.mxu0 %vm646_vm0, %v507_v18  ;;  %4255 = vmatprep.mubr.msk.f32.mxu1 %vm2451_vm1, %v5154_v17 }
  0xaf   : > { %4546 = vmatmul.mubr.msk.f32.gmra.mxu0 %vm646_vm0, %v508_v21  ;;  %v348_v21 = vld [vmem:[%s4942_s24 + $0x328] sm:$0xff] }
  0xb0   : > { %4548 = vmatprep.mubr.msk.f32.mxu0 %vm646_vm0, %v509_v22 }
  0xb3   : > { %4549 = vmatmul.mubr.msk.f32.gmra.mxu0 %vm646_vm0, %v510_v25  ;;  %v540_v25 = vmax.f32 %v348_v21, 0.0  ;;  %v369_v21 = vld [vmem:[%s4942_s24 + $0x3d0] sm:$0xff] }
  0xb4   : > { %4551 = vmatprep.mubr.msk.f32.mxu0 %vm646_vm0, %v511_v26  ;;  %v541_v26 = vmax.f32 %v349_v23, 0.0 }
  0xb7   : > { %4552 = vmatmul.mubr.msk.f32.gmra.mxu0 %vm646_vm0, %v512_v29  ;;  %v351_v29 = vld [vmem:[%s4942_s24 + $0x340] sm:$0xff] }
  0xb8   : > { %4554 = vmatprep.mubr.msk.f32.mxu0 %vm646_vm0, %v513_v30  ;;  %v543_v32 = vmax.f32 %v351_v29, 0.0 }
  0xbb   : > { %4555 = vmatmul.mubr.msk.f32.gmra.mxu0 %vm646_vm0, %v514_v33  ;;  %v352_v33 = vld [vmem:[%s4942_s24 + $0x348] sm:$0xff] }
  0xbc   : > { %4557 = vmatprep.mubr.msk.f32.mxu0 %vm646_vm0, %v515_v34 }
  0xbf   : > { %4558 = vmatmul.mubr.msk.f32.gmra.mxu0 %vm646_vm0, %v516_v37  ;;  %v544_v37 = vmax.f32 %v352_v33, 0.0  ;;  %v562_v33 = vmax.f32 %v370_v27, 0.0 }
  0xc0   : > { %4560 = vmatprep.mubr.msk.f32.mxu0 %vm646_vm0, %v517_v38  ;;  %v545_v38 = vmax.f32 %v353_v35, 0.0 }
  0xc3   : > { %4561 = vmatmul.mubr.msk.f32.gmra.mxu0 %vm646_vm0, %v518_v41  ;;  %v355_v41 = vld [vmem:[%s4942_s24 + $0x360] sm:$0xff] }
  0xc4   : > { %4563 = vmatprep.mubr.msk.f32.mxu0 %vm646_vm0, %v519_v42  ;;  %v547_v44 = vmax.f32 %v355_v41, 0.0 }
  0xc7   : > { %4564 = vmatmul.mubr.msk.f32.gmra.mxu0 %vm646_vm0, %v520_v45  ;;  %v356_v45 = vld [vmem:[%s4942_s24 + $0x368] sm:$0xff] }
  0xc8   : > { %4566 = vmatprep.mubr.msk.f32.mxu0 %vm646_vm0, %v521_v46 }
  0xcb   : > { %4567 = vmatmul.mubr.msk.f32.gmra.mxu0 %vm646_vm0, %v522_v49  ;;  %v548_v49 = vmax.f32 %v356_v45, 0.0  ;;  %v374_v45 = vld [vmem:[%s4942_s24 + $0x3f8] sm:$0xff] }
  0xcc   : > { %4569 = vmatprep.mubr.msk.f32.mxu0 %vm646_vm0, %v523_v50  ;;  %v549_v50 = vmax.f32 %v357_v47, 0.0  ;;  %v566_v51 = vmax.f32 %v374_v45, 0.0 }
  0xcf   : > { %4570 = vmatmul.mubr.msk.f32.gmra.mxu0 %vm646_vm0, %v524_v53  ;;  %v359_v53 = vld [vmem:[%s4942_s24 + $0x380] sm:$0xff] }
  0xd0   : > { %4572 = vmatprep.mubr.msk.f32.mxu0 %vm646_vm0, %v525_v54  ;;  %v551_v56 = vmax.f32 %v359_v53, 0.0 }
  0xd3   : > { %4573 = vmatmul.mubr.msk.f32.gmra.mxu0 %vm646_vm0, %v526_v57  ;;  %v360_v57 = vld [vmem:[%s4942_s24 + $0x388] sm:$0xff] }
  0xd4   : > { %4575 = vmatprep.mubr.msk.f32.mxu0 %vm646_vm0, %v527_v58 }
  0xd7   : > { %4576 = vmatmul.mubr.msk.f32.gmra.mxu0 %vm646_vm0, %v528_v61  ;;  %v552_v61 = vmax.f32 %v360_v57, 0.0  ;;  %v377_v57 = vld [vmem:[%s4942_s24 + $0x410] sm:$0xff] }
  0xd8   : > { %4578 = vmatprep.mubr.msk.f32.mxu0 %vm646_vm0, %v529_v62  ;;  %v553_v62 = vmax.f32 %v361_v59, 0.0  ;;  %v5277_v59 = vld [vmem:[%s6270_s2] ss:$0 sm:$0xff] }
  0xdb   : > { %4579 = vmatmul.mubr.msk.f32.gmra.mxu0 %vm646_vm0, %v530_v1  ;;  %v363_v1 = vld [vmem:[%s4942_s24 + $0x3a0] sm:$0xff] }
  0xdc   : > { %4581 = vmatprep.mubr.msk.f32.mxu0 %vm646_vm0, %v531_v2  ;;  %v555_v4 = vmax.f32 %v363_v1, 0.0 }
  0xdf   : > { %4582 = vmatmul.mubr.msk.f32.gmra.mxu0 %vm646_vm0, %v532_v5  ;;  %v364_v5 = vld [vmem:[%s4942_s24 + $0x3a8] sm:$0xff] }
  0xe0   : > { %4584 = vmatprep.mubr.msk.f32.mxu0 %vm646_vm0, %v533_v6 }
  0xe3   : > { %4585 = vmatmul.mubr.msk.f32.gmra.mxu0 %vm646_vm0, %v534_v9  ;;  %v556_v9 = vmax.f32 %v364_v5, 0.0 }
  0xe4   : > { %4587 = vmatprep.mubr.msk.f32.mxu0 %vm646_vm0, %v535_v10  ;;  %v557_v10 = vmax.f32 %v365_v7, 0.0  ;;  %v379_v7 = vld [vmem:[%s4942_s24 + $0x420] sm:$0xff] }
  0xe7   : > { %v5156_v18 = vpop.f32.mrf.mxu0  ;;  %4588 = vmatmul.mubr.msk.f32.gmra.mxu0 %vm646_vm0, %v536_v13  ;;  %v367_v13 = vld [vmem:[%s4942_s24 + $0x3c0] sm:$0xff] }
  0xe8   : > { %4590 = vmatprep.mubr.msk.f32.mxu0 %vm646_vm0, %v537_v14  ;;  %v559_v16 = vmax.f32 %v367_v13, 0.0 }
  0xe9   : > { %v5163_v22 = vpop.f32.mrf.mxu0 }
  0xeb   : > { %v5166_v24 = vpop.f32.mrf.mxu0  ;;  %4591 = vmatmul.mubr.msk.f32.gmra.mxu0 %vm646_vm0, %v538_v19  ;;  %v368_v19 = vld [vmem:[%s4942_s24 + $0x3c8] sm:$0xff] }
  0xec   : > { %4593 = vmatprep.mubr.msk.f32.mxu0 %vm646_vm0, %v539_v20 }
  0xed   : > { %v5171_v28 = vpop.f32.mrf.mxu0 }
  0xef   : > { %v5174_v30 = vpop.f32.mrf.mxu0  ;;  %4594 = vmatmul.mubr.msk.f32.gmra.mxu0 %vm646_vm0, %v540_v25  ;;  %v560_v25 = vmax.f32 %v368_v19, 0.0 }
  0xf0   : > { %4596 = vmatprep.mubr.msk.f32.mxu0 %vm646_vm0, %v541_v26  ;;  %v561_v26 = vmax.f32 %v369_v21, 0.0  ;;  %v571_v21 = vmax.f32 %v379_v7, 0.0 }
  0xf1   : > { %v5179_v34 = vpop.f32.mrf.mxu0 }
  0xf3   : > { %v5182_v36 = vpop.f32.mrf.mxu0  ;;  %4597 = vmatmul.mubr.msk.f32.gmra.mxu0 %vm646_vm0, %v542_v31  ;;  %v371_v31 = vld [vmem:[%s4942_s24 + $0x3e0] sm:$0xff] }
  0xf4   : > { %4599 = vmatprep.mubr.msk.f32.mxu0 %vm646_vm0, %v543_v32  ;;  %v563_v35 = vmax.f32 %v371_v31, 0.0 }
  0xf5   : > { %v5187_v40 = vpop.f32.mrf.mxu0 }
  0xf7   : > { %v5190_v42 = vpop.f32.mrf.mxu0  ;;  %4600 = vmatmul.mubr.msk.f32.gmra.mxu0 %vm646_vm0, %v544_v37  ;;  %v372_v37 = vld [vmem:[%s4942_s24 + $0x3e8] sm:$0xff] }
  0xf8   : > { %4602 = vmatprep.mubr.msk.f32.mxu0 %vm646_vm0, %v545_v38 }
  0xf9   : > { %v5195_v46 = vpop.f32.mrf.mxu0 }
  0xfb   : > { %v5198_v48 = vpop.f32.mrf.mxu0  ;;  %4603 = vmatmul.mubr.msk.f32.gmra.mxu0 %vm646_vm0, %v546_v43  ;;  %v564_v43 = vmax.f32 %v372_v37, 0.0  ;;  %v4839_v37 = vmov 0  }
  0xfc   : > { %4605 = vmatprep.mubr.msk.f32.mxu0 %vm646_vm0, %v547_v44  ;;  %v565_v44 = vmax.f32 %v373_v39, 0.0  ;;  %4774 = vset.pattern.permute.xlu0 %v4839_v37  ;;  %v2441_v39 = vld [vmem:[#allocation2] sm:$0x1] }
  0xfd   : > { %v5203_v52 = vpop.f32.mrf.mxu0  ;;  %2444 = vperm.xlu0 %4774, %v2441_v39  }
  0xff   : > { %v5206_v54 = vpop.f32.mrf.mxu0  ;;  %4606 = vmatmul.mubr.msk.f32.gmra.mxu0 %vm646_vm0, %v548_v49  ;;  %v375_v49 = vld [vmem:[%s4942_s24 + $0x400] sm:$0xff] }
 0x100   : > { %4608 = vmatprep.mubr.msk.f32.mxu0 %vm646_vm0, %v549_v50  ;;  %v567_v53 = vmax.f32 %v375_v49, 0.0  ;;  %v1355_v27 = vadd.f32 %v5206_v54, %v5277_v59  ;;  %v382_v49 = vld [vmem:[%s4942_s24 + $0x438] sm:$0xff] }
 0x101   : > { %v5211_v58 = vpop.f32.mrf.mxu0 }
 0x103   : > { %v5214_v60 = vpop.f32.mrf.mxu0  ;;  %4609 = vmatmul.mubr.msk.f32.gmra.mxu0 %vm646_vm0, %v550_v55  ;;  %v376_v55 = vld [vmem:[%s4942_s24 + $0x408] sm:$0xff] }
 0x104   : > { %4611 = vmatprep.mubr.msk.f32.mxu0 %vm646_vm0, %v551_v56  ;;  %v568_v63 = vmax.f32 %v376_v55, 0.0 }
 0x105   : > { %v5219_v0 = vpop.f32.mrf.mxu0 }
 0x107   : > { %v5222_v2 = vpop.f32.mrf.mxu0  ;;  %4612 = vmatmul.mubr.msk.f32.gmra.mxu0 %vm646_vm0, %v552_v61  ;;  %v1365_v61 = vadd.f32 %v5214_v60, %v5277_v59  ;;  %v1360_v60 = vadd.f32 %v5277_v59, %v5219_v0  ;;  %v381_v0 = vld [vmem:[%s4942_s24 + $0x430] sm:$0xff] }
 0x108   : > { %4614 = vmatprep.mubr.msk.f32.mxu0 %vm646_vm0, %v553_v62  ;;  %v573_v45 = vmax.f32 %v381_v0, 0.0 }
 0x109   : > { %v5227_v6 = vpop.f32.mrf.mxu0  ;;  %v2263_v11 = vmax.f32 %v1365_v61, 0.0  ;;  %v2262_v31 = vmax.f32 %v1360_v60, 0.0 }
 0x10b   : > { %v5230_v8 = vpop.f32.mrf.mxu0  ;;  %4615 = vmatmul.mubr.msk.f32.gmra.mxu0 %vm646_vm0, %v554_v3  ;;  %v569_v3 = vmax.f32 %v377_v57, 0.0 }
 0x10c   : > { %4617 = vmatprep.mubr.msk.f32.mxu0 %vm646_vm0, %v555_v4  ;;  %v378_v4 = vld [vmem:[%s4942_s24 + $0x418] sm:$0xff] }
 0x10d   : > { %v5235_v12 = vpop.f32.mrf.mxu0 }
 0x10f   : > { %v5238_v14 = vpop.f32.mrf.mxu0  ;;  %4618 = vmatmul.mubr.msk.f32.gmra.mxu0 %vm646_vm0, %v556_v9 }
 0x110   : > { %4620 = vmatprep.mubr.msk.f32.mxu0 %vm646_vm0, %v557_v10 }
 0x111   : > { %v5243_v20 = vpop.f32.mrf.mxu0 }
 0x113   : > { %v5246_v23 = vpop.f32.mrf.mxu0  ;;  %4621 = vmatmul.mubr.msk.f32.gmra.mxu0 %vm646_vm0, %v558_v15  ;;  %v570_v15 = vmax.f32 %v378_v4, 0.0 }
 0x114   : > { %4623 = vmatprep.mubr.msk.f32.mxu0 %vm646_vm0, %v559_v16 }
 0x115   : > { %v5251_v29 = vpop.f32.mrf.mxu0 }
 0x117   : > { %v5254_v32 = vpop.f32.mrf.mxu0  ;;  %4624 = vmatmul.mubr.msk.f32.gmra.mxu0 %vm646_vm0, %v560_v25  ;;  %v380_v25 = vld [vmem:[%s4942_s24 + $0x428] sm:$0xff] }
 0x118   : > { %4626 = vmatprep.mubr.msk.f32.mxu0 %vm646_vm0, %v561_v26 }
 0x119   : > { %v5259_v38 = vpop.f32.mrf.mxu0 }
 0x11b   : > { %v5262_v41 = vpop.f32.mrf.mxu0  ;;  %4627 = vmatmul.mubr.msk.f32.gmra.mxu0 %vm646_vm0, %v562_v33 }
 0x11c   : > { %4629 = vmatprep.mubr.msk.f32.mxu0 %vm646_vm0, %v563_v35  ;;  %v572_v35 = vmax.f32 %v380_v25, 0.0  ;;  %v1425_v57 = vadd.f32 %v5262_v41, %v5277_v59 }
 0x11d   : > { %v5267_v47 = vpop.f32.mrf.mxu0 }
 0x11e   : > { %v2275_v7 = vmax.f32 %v1425_v57, 0.0  ;;  %v1405_v57 = vadd.f32 %v5246_v23, %v5277_v59 }
 0x11f   : > { %v4487_v50 = vpop.f32.mrf.mxu0  ;;  %4630 = vmatmul.mubr.msk.f32.gmra.mxu0 %vm646_vm0, %v564_v43 }
 0x120   : > { %4632 = vmatprep.mubr.msk.f32.mxu0 %vm646_vm0, %v565_v44  ;;  %v1435_v16 = vadd.f32 %v4487_v50, %v5277_v59  ;;  %v383_v50 = vld [vmem:[%s4942_s24 + $0x440] sm:$0xff] }
 0x121   : > { %v1429_v56 = vpop.f32.mrf.mxu0 }
 0x122   : > { %v2277_v43 = vmax.f32 %v1435_v16, 0.0  ;;  %v1430_v44 = vadd.f32 %v5277_v59, %v1429_v56  ;;  %v574_v56 = vmax.f32 %v382_v49, 0.0  ;;  %v1340_v16 = vadd.f32 %v5277_v59, %v5203_v52  ;;  %v389_v52 = vld [vmem:[%s4942_s24 + $0x470] sm:$0xff]  ;;  %v390_v49 = vld [vmem:[%s4942_s24 + $0x478] sm:$0xff] }
 0x123   : > { %v4490_v62 = vpop.f32.mrf.mxu0  ;;  %4633 = vmatmul.mubr.msk.f32.gmra.mxu0 %vm646_vm0, %v566_v51  ;;  %v2261_v51 = vmax.f32 %v1355_v27, 0.0  ;;  %v388_v27 = vld [vmem:[%s4942_s24 + $0x468] sm:$0xff] }
 0x124   : > { %v1445_v1 = vadd.f32 %v4490_v62, %v5277_v59  ;;  %4635 = vmatprep.mubr.msk.f32.mxu0 %vm646_vm0, %v567_v53  ;;  %v1350_v53 = vadd.f32 %v5277_v59, %v5211_v58  ;;  %v2276_v61 = vmax.f32 %v1430_v44, 0.0  ;;  %v575_v62 = vmax.f32 %v383_v50, 0.0  ;;  %v385_v58 = vld [vmem:[%s4942_s24 + $0x450] sm:$0xff] }
 0x125   : > { %v1439_v5 = vpop.f32.mrf.mxu0  ;;  %v2258_v37 = vmax.f32 %v1340_v16, 0.0  ;;  %v1410_v44 = vadd.f32 %v5277_v59, %v5259_v38  ;;  %v582_v38 = vmax.f32 %v390_v49, 0.0  ;;  %v1320_v16 = vadd.f32 %v5277_v59, %v5187_v40  ;;  %v397_v40 = vld [vmem:[%s4942_s24 + $0x4b0] sm:$0xff]  ;;  %v398_v49 = vld [vmem:[%s4942_s24 + $0x4b8] sm:$0xff] }
 0x126   : > { %v2279_v9 = vmax.f32 %v1445_v1, 0.0  ;;  %v1440_v10 = vadd.f32 %v5277_v59, %v1439_v5  ;;  %v2260_v4 = vmax.f32 %v1350_v53, 0.0  ;;  %v1330_v53 = vadd.f32 %v5277_v59, %v5195_v46  ;;  %v393_v46 = vld [vmem:[%s4942_s24 + $0x490] sm:$0xff] }
 0x127   : > { %v5289_v13 = vpop.f32.mrf.mxu0  ;;  %4636 = vmatmul.mubr.msk.f32.gmra.mxu0 %vm646_vm0, %v568_v63  ;;  %v384_v63 = vld [vmem:[%s4942_s24 + $0x448] sm:$0xff] }
 0x128   : > { %v2278_v19 = vmax.f32 %v1440_v10, 0.0  ;;  %4223 = vmatprep.subr.msk.mxu1 %vm2451_vm1, %v2279_v9  ;;  %4638 = vmatprep.mubr.msk.f32.mxu0 %vm646_vm0, %v569_v3  ;;  %v1345_v3 = vadd.f32 %v5198_v48, %v5277_v59  ;;  %v576_v41 = vmax.f32 %v384_v63, 0.0  ;;  %v1420_v9 = vadd.f32 %v5277_v59, %v5267_v47  ;;  %v387_v48 = vld [vmem:[%s4942_s24 + $0x460] sm:$0xff]  ;;  %v392_v63 = vld [vmem:[%s4942_s24 + $0x488] sm:$0xff] }
 0x129   : > { %v5296_v26 = vpop.f32.mrf.mxu0  ;;  %4224 = vmatpush3.xpose.msk.msra.mxu1 %vm2451_vm1, %v2263_v11  ;;  %v577_v10 = vmax.f32 %v385_v58, 0.0  ;;  %v386_v11 = vld [vmem:[%s4942_s24 + $0x458] sm:$0xff]  ;;  %v579_v0 = vmax.f32 %v387_v48, 0.0  ;;  %v584_v23 = vmax.f32 %v392_v63, 0.0  ;;  %v400_v63 = vld [vmem:[%s4942_s24 + $0x4c8] sm:$0xff] }
 0x12a   : > { %4225 = vmatprep.subr.msk.mxu1 %vm2451_vm1, %v2278_v19  ;;  %v578_v47 = vmax.f32 %v386_v11, 0.0  ;;  %v2274_v25 = vmax.f32 %v1420_v9, 0.0  ;;  %v1400_v9 = vadd.f32 %v5277_v59, %v5251_v29  ;;  %v394_v11 = vld [vmem:[%s4942_s24 + $0x498] sm:$0xff] }
 0x12b   : > { %v5303_v33 = vpop.f32.mrf.mxu0  ;;  %4639 = vmatmul.mubr.msk.f32.gmra.mxu0 %vm646_vm0, %v570_v15  ;;  %v2259_v15 = vmax.f32 %v1345_v3, 0.0  ;;  %v1325_v3 = vadd.f32 %v5182_v36, %v5277_v59  ;;  %v395_v36 = vld [vmem:[%s4942_s24 + $0x4a0] sm:$0xff]  ;;  %v586_v29 = vmax.f32 %v394_v11, 0.0  ;;  %v402_v11 = vld [vmem:[%s4942_s24 + $0x4d8] sm:$0xff] }
 0x12c   : > { %4641 = vmatprep.mubr.msk.f32.mxu0 %vm646_vm0, %v571_v21  ;;  %v1415_v21 = vadd.f32 %v5254_v32, %v5277_v59  ;;  %v580_v32 = vmax.f32 %v388_v27, 0.0  ;;  %v396_v27 = vld [vmem:[%s4942_s24 + $0x4a8] sm:$0xff] }
 0x12d   : > { %v5309_v54 = vpop.f32.mrf.mxu0  ;;  %4226 = vmatpush3.xpose.msk.msra.mxu1 %vm2451_vm1, %v2262_v31 }
 0x12e   : > { %4227 = vmatprep.subr.msk.mxu1 %vm2451_vm1, %v2277_v43  ;;  %v2273_v43 = vmax.f32 %v1415_v21, 0.0  ;;  %v1395_v21 = vadd.f32 %v5238_v14, %v5277_v59  ;;  %v588_v14 = vmax.f32 %v396_v27, 0.0  ;;  %v404_v27 = vld [vmem:[%s4942_s24 + $0x4e8] sm:$0xff] }
 0x12f   : > { %v5316_v55 = vpop.f32.mrf.mxu0  ;;  %4642 = vmatmul.mubr.msk.f32.gmra.mxu0 %vm646_vm0, %v572_v35  ;;  %v1335_v35 = vadd.f32 %v5190_v42, %v5277_v59  ;;  %v391_v42 = vld [vmem:[%s4942_s24 + $0x480] sm:$0xff] }
 0x130   : > { %4644 = vmatprep.mubr.msk.f32.mxu0 %vm646_vm0, %v573_v45  ;;  %v581_v45 = vmax.f32 %v389_v52, 0.0 }
 0x131   : > { %v5323_v1 = vpop.f32.mrf.mxu0  ;;  %4228 = vmatpush3.xpose.msk.msra.mxu1 %vm2451_vm1, %v2261_v51  ;;  %v2257_v51 = vmax.f32 %v1335_v35, 0.0  ;;  %v1315_v35 = vadd.f32 %v5174_v30, %v5277_v59  ;;  %v399_v30 = vld [vmem:[%s4942_s24 + $0x4c0] sm:$0xff] }
 0x132   : > { %4229 = vmatprep.subr.msk.mxu1 %vm2451_vm1, %v2276_v61  ;;  %v2272_v61 = vmax.f32 %v1410_v44, 0.0  ;;  %v1390_v44 = vadd.f32 %v5277_v59, %v5243_v20  ;;  %v590_v20 = vmax.f32 %v398_v49, 0.0  ;;  %v406_v49 = vld [vmem:[%s4942_s24 + $0x4f8] sm:$0xff] }
 0x133   : > { %v5330_v5 = vpop.f32.mrf.mxu0  ;;  %4645 = vmatmul.mubr.msk.f32.gmra.mxu0 %vm646_vm0, %v574_v56 }
 0x134   : > { %4647 = vmatprep.mubr.msk.f32.mxu0 %vm646_vm0, %v575_v62  ;;  %v583_v62 = vmax.f32 %v391_v42, 0.0 }
 0x135   : > { %v5337_v60 = vpop.f32.mrf.mxu0  ;;  %4230 = vmatpush3.xpose.msk.msra.mxu1 %vm2451_vm1, %v2260_v4  ;;  %v2256_v4 = vmax.f32 %v1330_v53, 0.0  ;;  %v1310_v53 = vadd.f32 %v5277_v59, %v5179_v34  ;;  %v401_v34 = vld [vmem:[%s4942_s24 + $0x4d0] sm:$0xff] }
 0x136   : > { %4231 = vmatprep.subr.msk.mxu1 %vm2451_vm1, %v2275_v7  ;;  %v2271_v7 = vmax.f32 %v1405_v57, 0.0  ;;  %v1385_v57 = vadd.f32 %v5230_v8, %v5277_v59  ;;  %v592_v8 = vmax.f32 %v400_v63, 0.0 }
 0x137   : > { %v5344_v19 = vpop.f32.mrf.mxu0  ;;  %4648 = vmatmul.mubr.msk.f32.gmra.mxu0 %vm646_vm0, %v576_v41 }
 0x138   : > { %4650 = vmatprep.mubr.msk.f32.mxu0 %vm646_vm0, %v577_v10  ;;  %v585_v10 = vmax.f32 %v393_v46, 0.0 }
 0x139   : > { %v5351_v31 = vpop.f32.mrf.mxu0  ;;  %4232 = vmatpush3.xpose.msk.msra.mxu1 %vm2451_vm1, %v2259_v15  ;;  %v2255_v15 = vmax.f32 %v1325_v3, 0.0  ;;  %v1305_v3 = vadd.f32 %v5166_v24, %v5277_v59  ;;  %v403_v24 = vld [vmem:[%s4942_s24 + $0x4e0] sm:$0xff] }
 0x13a   : > { %4233 = vmatprep.subr.msk.mxu1 %vm2451_vm1, %v2274_v25  ;;  %v2270_v25 = vmax.f32 %v1400_v9, 0.0  ;;  %v1380_v9 = vadd.f32 %v5277_v59, %v5235_v12  ;;  %v594_v12 = vmax.f32 %v402_v11, 0.0 }
 0x13b   : > { %v5358_v39 = vpop.f32.mrf.mxu0  ;;  %4651 = vmatmul.mubr.msk.f32.gmra.mxu0 %vm646_vm0, %v578_v47 }
 0x13c   : > { %4653 = vmatprep.mubr.msk.f32.mxu0 %vm646_vm0, %v579_v0  ;;  %v587_v0 = vmax.f32 %v395_v36, 0.0 }
 0x13d   : > { %v5365_v50 = vpop.f32.mrf.mxu0  ;;  %4234 = vmatpush3.xpose.msk.msra.mxu1 %vm2451_vm1, %v2258_v37  ;;  %v2254_v37 = vmax.f32 %v1320_v16, 0.0  ;;  %v1300_v16 = vadd.f32 %v5277_v59, %v5171_v28  ;;  %v405_v28 = vld [vmem:[%s4942_s24 + $0x4f0] sm:$0xff] }
 0x13e   : > { %4235 = vmatprep.subr.msk.mxu1 %vm2451_vm1, %v2273_v43  ;;  %v2269_v43 = vmax.f32 %v1395_v21, 0.0  ;;  %v1375_v21 = vadd.f32 %v5222_v2, %v5277_v59  ;;  %v596_v2 = vmax.f32 %v404_v27, 0.0 }
 0x13f   : > { %v5372_v56 = vpop.f32.mrf.mxu0  ;;  %4654 = vmatmul.mubr.msk.f32.gmra.mxu0 %vm646_vm0, %v580_v32 }
 0x140   : > { %4656 = vmatprep.mubr.msk.f32.mxu0 %vm646_vm0, %v581_v45  ;;  %v589_v45 = vmax.f32 %v397_v40, 0.0 }
 0x141   : > { %v5379_v58 = vpop.f32.mrf.mxu0  ;;  %4236 = vmatpush3.xpose.msk.msra.mxu1 %vm2451_vm1, %v2257_v51  ;;  %v2253_v51 = vmax.f32 %v1315_v35, 0.0  ;;  %v1295_v35 = vadd.f32 %v5156_v18, %v5277_v59  ;;  %v407_v18 = vld [vmem:[%s4942_s24 + $0x500] sm:$0xff] }
 0x142   : > { %4237 = vmatprep.subr.msk.mxu1 %vm2451_vm1, %v2272_v61  ;;  %v2268_v61 = vmax.f32 %v1390_v44, 0.0  ;;  %v1370_v44 = vadd.f32 %v5277_v59, %v5227_v6  ;;  %v598_v6 = vmax.f32 %v406_v49, 0.0 }
 0x143   : > { %v5386_v41 = vpop.f32.mrf.mxu0  ;;  %4657 = vmatmul.mubr.msk.f32.gmra.mxu0 %vm646_vm0, %v582_v38 }
 0x144   : > { %4659 = vmatprep.mubr.msk.f32.mxu0 %vm646_vm0, %v583_v62  ;;  %v591_v62 = vmax.f32 %v399_v30, 0.0 }
 0x145   : > { %v5393_v48 = vpop.f32.mrf.mxu0  ;;  %4238 = vmatpush3.xpose.msk.msra.mxu1 %vm2451_vm1, %v2256_v4  ;;  %v2252_v4 = vmax.f32 %v1310_v53, 0.0  ;;  %v1290_v53 = vadd.f32 %v5277_v59, %v5163_v22  ;;  %v1525_v22 = vadd.f32 %v5386_v41, %v5277_v59 }
 0x146   : > { %4239 = vmatprep.subr.msk.mxu1 %vm2451_vm1, %v2271_v7  ;;  %v2267_v7 = vmax.f32 %v1385_v57, 0.0  ;;  %v2264_v57 = vmax.f32 %v1370_v44, 0.0 }
 0x147   : > { %v5400_v47 = vpop.f32.mrf.mxu0  ;;  %4660 = vmatmul.mubr.msk.f32.gmra.mxu0 %vm646_vm0, %v584_v23  ;;  %v2295_v41 = vmax.f32 %v1525_v22, 0.0 }
 0x148   : > { %4662 = vmatprep.mubr.msk.f32.mxu0 %vm646_vm0, %v585_v10  ;;  %v593_v10 = vmax.f32 %v401_v34, 0.0  ;;  %v409_v34 = vld [vmem:[%s4942_s24 + $0x510] sm:$0xff] }
 0x149   : > { %v5407_v52 = vpop.f32.mrf.mxu0  ;;  %4240 = vmatpush3.xpose.msk.msra.mxu1 %vm2451_vm1, %v2255_v15  ;;  %v2251_v15 = vmax.f32 %v1305_v3, 0.0  ;;  %v2248_v3 = vmax.f32 %v1290_v53, 0.0  ;;  %v601_v11 = vmax.f32 %v409_v34, 0.0  ;;  %v414_v53 = vld [vmem:[%s4942_s24 + $0x538] sm:$0xff] }
 0x14a   : > { %4241 = vmatprep.subr.msk.mxu1 %vm2451_vm1, %v2270_v25  ;;  %v2266_v25 = vmax.f32 %v1380_v9, 0.0  ;;  %v410_v9 = vld [vmem:[%s4942_s24 + $0x518] sm:$0xff] }
 0x14b   : > { %v5414_v32 = vpop.f32.mrf.mxu0  ;;  %4663 = vmatmul.mubr.msk.f32.gmra.mxu0 %vm646_vm0, %v586_v29 }
 0x14c   : > { %4665 = vmatprep.mubr.msk.f32.mxu0 %vm646_vm0, %v587_v0  ;;  %v595_v0 = vmax.f32 %v403_v24, 0.0  ;;  %v411_v24 = vld [vmem:[%s4942_s24 + $0x520] sm:$0xff] }
 0x14d   : > { %v5421_v42 = vpop.f32.mrf.mxu0  ;;  %4242 = vmatpush3.xpose.msk.msra.mxu1 %vm2451_vm1, %v2254_v37  ;;  %v2250_v37 = vmax.f32 %v1300_v16, 0.0 }
 0x14e   : > { %4243 = vmatprep.subr.msk.mxu1 %vm2451_vm1, %v2269_v43  ;;  %v2265_v43 = vmax.f32 %v1375_v21, 0.0 }
 0x14f   : > { %v5428_v38 = vpop.f32.mrf.mxu0  ;;  %4666 = vmatmul.mubr.msk.f32.gmra.mxu0 %vm646_vm0, %v588_v14 }
 0x150   : > { %4668 = vmatprep.mubr.msk.f32.mxu0 %vm646_vm0, %v589_v45  ;;  %v597_v45 = vmax.f32 %v405_v28, 0.0  ;;  %v603_v28 = vmax.f32 %v411_v24, 0.0  ;;  %v418_v24 = vld [vmem:[%s4942_s24 + $0x558] sm:$0xff] }
 0x151   : > { %v5435_v46 = vpop.f32.mrf.mxu0  ;;  %4244 = vmatpush3.xpose.msk.msra.mxu1 %vm2451_vm1, %v2253_v51  ;;  %v2249_v51 = vmax.f32 %v1295_v35, 0.0  ;;  %v412_v35 = vld [vmem:[%s4942_s24 + $0x528] sm:$0xff] }
 0x152   : > { %4245 = vmatprep.subr.msk.mxu1 %vm2451_vm1, %v2268_v61  ;;  %v599_v61 = vmax.f32 %v407_v18, 0.0 }
 0x153   : > { %v5442_v23 = vpop.f32.mrf.mxu0  ;;  %4669 = vmatmul.mubr.msk.f32.gmra.mxu0 %vm646_vm0, %v590_v20 }
 0x154   : > { %4671 = vmatprep.mubr.msk.f32.mxu0 %vm646_vm0, %v591_v62  ;;  %v408_v62 = vld [vmem:[%s4942_s24 + $0x508] sm:$0xff] }
 0x155   : > { %v5449_v36 = vpop.f32.mrf.mxu0  ;;  %4246 = vmatpush3.xpose.msk.msra.mxu1 %vm2451_vm1, %v2252_v4 }
 0x156   : > { %4247 = vmatprep.subr.msk.mxu1 %vm2451_vm1, %v2267_v7 }
 0x157   : > { %v5456_v29 = vpop.f32.mrf.mxu0  ;;  %4672 = vmatmul.mubr.msk.f32.gmra.mxu0 %vm646_vm0, %v592_v8  ;;  %v600_v8 = vmax.f32 %v408_v62, 0.0 }
 0x158   : > { %4674 = vmatprep.mubr.msk.f32.mxu0 %vm646_vm0, %v593_v10 }
 0x159   : > { %v5463_v40 = vpop.f32.mrf.mxu0  ;;  %4248 = vmatpush3.xpose.msk.msra.mxu1 %vm2451_vm1, %v2251_v15 }
 0x15a   : > { %4249 = vmatprep.subr.msk.mxu1 %vm2451_vm1, %v2266_v25  ;;  %v602_v25 = vmax.f32 %v410_v9, 0.0 }
 0x15b   : > { %v5470_v14 = vpop.f32.mrf.mxu0  ;;  %4675 = vmatmul.mubr.msk.f32.gmra.mxu0 %vm646_vm0, %v594_v12  ;;  %v1520_v12 = vadd.f32 %v5277_v59, %v5393_v48  ;;  %v413_v48 = vld [vmem:[%s4942_s24 + $0x530] sm:$0xff] }
 0x15c   : > { %4677 = vmatprep.mubr.msk.f32.mxu0 %vm646_vm0, %v595_v0  ;;  %v1585_v62 = vadd.f32 %v5470_v14, %v5277_v59 }
 0x15d   : > { %v5477_v30 = vpop.f32.mrf.mxu0  ;;  %4250 = vmatpush3.xpose.msk.msra.mxu1 %vm2451_vm1, %v2250_v37 }
 0x15e   : > { %4251 = vmatprep.subr.msk.mxu1 %vm2451_vm1, %v2265_v43  ;;  %v2294_v43 = vmax.f32 %v1520_v12, 0.0  ;;  %v2307_v9 = vmax.f32 %v1585_v62, 0.0 }
 0x15f   : > { %v4535_v20 = vpop.f32.mrf.mxu0  ;;  %4678 = vmatmul.mubr.msk.f32.gmra.mxu0 %vm646_vm0, %v596_v2  ;;  %v1515_v2 = vadd.f32 %v5372_v56, %v5277_v59 }
 0x160   : > { %4680 = vmatprep.mubr.msk.f32.mxu0 %vm646_vm0, %v597_v45  ;;  %v1595_v0 = vadd.f32 %v4535_v20, %v5277_v59  ;;  %v604_v45 = vmax.f32 %v412_v35, 0.0 }
 0x161   : > { %v1589_v63 = vpop.f32.mrf.mxu0  ;;  %4252 = vmatpush3.xpose.msk.msra.mxu1 %vm2451_vm1, %v2249_v51  ;;  %v605_v51 = vmax.f32 %v413_v48, 0.0  ;;  %v2293_v56 = vmax.f32 %v1515_v2, 0.0  ;;  %v1495_v48 = vadd.f32 %v5344_v19, %v5277_v59  ;;  %v423_v19 = vld [vmem:[%s4942_s24 + $0x580] sm:$0xff] }
 0x162   : > { %4253 = vmatprep.subr.msk.mxu1 %vm2451_vm1, %v2264_v57  ;;  %v2309_v49 = vmax.f32 %v1595_v0, 0.0  ;;  %v1590_v18 = vadd.f32 %v5277_v59, %v1589_v63 }
 0x163   : > { %v4538_v4 = vpop.f32.mrf.mxu0  ;;  %4681 = vmatmul.mubr.msk.f32.gmra.mxu0 %vm646_vm0, %v598_v6  ;;  %v1510_v6 = vadd.f32 %v5277_v59, %v5379_v58  ;;  %v417_v58 = vld [vmem:[%s4942_s24 + $0x550] sm:$0xff] }
 0x164   : > { %v1605_v7 = vadd.f32 %v4538_v4, %v5277_v59  ;;  %4683 = vmatprep.mubr.msk.f32.mxu0 %vm646_vm0, %v599_v61  ;;  %v606_v61 = vmax.f32 %v414_v53, 0.0  ;;  %v2308_v63 = vmax.f32 %v1590_v18, 0.0  ;;  %v1505_v4 = vadd.f32 %v5358_v39, %v5277_v59  ;;  %v419_v39 = vld [vmem:[%s4942_s24 + $0x560] sm:$0xff] }
 0x165   : > { %v1599_v10 = vpop.f32.mrf.mxu0  ;;  %4254 = vmatpush3.xpose.msk.msra.mxu1 %vm2451_vm1, %v2248_v3  ;;  %v416_v3 = vld [vmem:[%s4942_s24 + $0x548] sm:$0xff] }
 0x166   : > { %v2311_v15 = vmax.f32 %v1605_v7, 0.0  ;;  %v1600_v16 = vadd.f32 %v5277_v59, %v1599_v10  ;;  %v608_v14 = vmax.f32 %v416_v3, 0.0  ;;  %v1580_v10 = vadd.f32 %v5277_v59, %v5477_v30 }
 0x167   : > { %v5501_v21 = vpop.f32.mrf.mxu0  ;;  %4684 = vmatmul.mubr.msk.f32.gmra.mxu0 %vm646_vm0, %v600_v8  ;;  %v2292_v8 = vmax.f32 %v1510_v6, 0.0  ;;  %v610_v30 = vmax.f32 %v418_v24, 0.0 }
 0x168   : > { %v2310_v27 = vmax.f32 %v1600_v16, 0.0  ;;  %4256 = vmatmul.mubr.msk.f32.vlgmr.msra.gmra.mxu1 %vm2451_vm1, %v5154_v17  ;;  %4257 = vmatprep.subr.msk.mxu1 %vm2451_vm1, %v2311_v15  ;;  %v2291_v16 = vmax.f32 %v1505_v4, 0.0  ;;  %v2306_v0 = vmax.f32 %v1580_v10, 0.0 }
 0x169   : > { %v5509_v37 = vpop.f32.mrf.mxu0  ;;  %4258 = vmatpush3.xpose.msk.msra.mxu1 %vm2451_vm1, %v2295_v41  ;;  %4686 = vmatprep.mubr.msk.f32.mxu0 %vm646_vm0, %v601_v11  ;;  %v609_v11 = vmax.f32 %v417_v58, 0.0  ;;  %v1500_v41 = vadd.f32 %v5277_v59, %v5365_v50  ;;  %v421_v50 = vld [vmem:[%s4942_s24 + $0x570] sm:$0xff]  ;;  %v1485_v58 = vadd.f32 %v5330_v5, %v5277_v59  ;;  %v427_v5 = vld [vmem:[%s4942_s24 + $0x5a0] sm:$0xff] }
 0x16a   : > { %4259 = vmatprep.subr.msk.mxu1 %vm2451_vm1, %v2310_v27  ;;  %4289 = vmatprep.mubr.msk.f32.mxu1 %vm2451_vm1, %v5154_v17  ;;  %v415_v17 = vld [vmem:[%s4942_s24 + $0x540] sm:$0xff]  ;;  %v611_v27 = vmax.f32 %v419_v39, 0.0  ;;  %v613_v18 = vmax.f32 %v421_v50, 0.0  ;;  %v1475_v50 = vadd.f32 %v5316_v55, %v5277_v59 }
 0x16b   : > { %v5519_v44 = vpop.f32.mrf.mxu0  ;;  %4687 = vmatmul.mubr.msk.f32.gmra.mxu0 %vm646_vm0, %v602_v25  ;;  %v607_v34 = vmax.f32 %v415_v17, 0.0  ;;  %v1575_v25 = vadd.f32 %v5456_v29, %v5277_v59  ;;  %v2290_v2 = vmax.f32 %v1500_v41, 0.0  ;;  %v2289_v17 = vmax.f32 %v1495_v48, 0.0  ;;  %v431_v55 = vld [vmem:[%s4942_s24 + $0x5c0] sm:$0xff] }
 0x16c   : > { %4689 = vmatprep.mubr.msk.f32.mxu0 %vm646_vm0, %v603_v28  ;;  %v420_v28 = vld [vmem:[%s4942_s24 + $0x568] sm:$0xff]  ;;  %v2287_v39 = vmax.f32 %v1485_v58, 0.0 }
 0x16d   : > { %v5525_v20 = vpop.f32.mrf.mxu0  ;;  %4260 = vmatpush3.xpose.msk.msra.mxu1 %vm2451_vm1, %v2294_v43  ;;  %v612_v29 = vmax.f32 %v420_v28, 0.0 }
 0x16e   : > { %4261 = vmatprep.subr.msk.mxu1 %vm2451_vm1, %v2309_v49  ;;  %v1570_v49 = vadd.f32 %v5277_v59, %v5463_v40 }
 0x16f   : > { %v5532_v57 = vpop.f32.mrf.mxu0  ;;  %4690 = vmatmul.mubr.msk.f32.gmra.mxu0 %vm646_vm0, %v604_v45  ;;  %v2305_v45 = vmax.f32 %v1575_v25, 0.0 }
 0x170   : > { %4692 = vmatprep.mubr.msk.f32.mxu0 %vm646_vm0, %v605_v51  ;;  %v422_v51 = vld [vmem:[%s4942_s24 + $0x578] sm:$0xff]  ;;  %v2304_v62 = vmax.f32 %v1570_v49, 0.0 }
 0x171   : > { %v5539_v22 = vpop.f32.mrf.mxu0  ;;  %4262 = vmatpush3.xpose.msk.msra.mxu1 %vm2451_vm1, %v2293_v56  ;;  %v1490_v56 = vadd.f32 %v5277_v59, %v5351_v31  ;;  %v614_v40 = vmax.f32 %v422_v51, 0.0  ;;  %v425_v31 = vld [vmem:[%s4942_s24 + $0x590] sm:$0xff] }
 0x172   : > { %4263 = vmatprep.subr.msk.mxu1 %vm2451_vm1, %v2308_v63  ;;  %v615_v63 = vmax.f32 %v423_v19, 0.0  ;;  %v617_v10 = vmax.f32 %v425_v31, 0.0  ;;  %v2285_v19 = vmax.f32 %v1475_v50, 0.0  ;;  %v1465_v31 = vadd.f32 %v5303_v33, %v5277_v59  ;;  %v435_v33 = vld [vmem:[%s4942_s24 + $0x5e0] sm:$0xff] }
 0x173   : > { %v5546_v7 = vpop.f32.mrf.mxu0  ;;  %4693 = vmatmul.mubr.msk.f32.gmra.mxu0 %vm646_vm0, %v606_v61  ;;  %v1565_v61 = vadd.f32 %v5442_v23, %v5277_v59  ;;  %v2288_v4 = vmax.f32 %v1490_v56, 0.0 }
 0x174   : > { %4695 = vmatprep.mubr.msk.f32.mxu0 %vm646_vm0, %v607_v34  ;;  %v424_v34 = vld [vmem:[%s4942_s24 + $0x588] sm:$0xff] }
 0x175   : > { %v5553_v15 = vpop.f32.mrf.mxu0  ;;  %4264 = vmatpush3.xpose.msk.msra.mxu1 %vm2451_vm1, %v2292_v8  ;;  %v616_v23 = vmax.f32 %v424_v34, 0.0 }
 0x176   : > { %4265 = vmatprep.subr.msk.mxu1 %vm2451_vm1, %v2307_v9  ;;  %v1560_v9 = vadd.f32 %v5277_v59, %v5449_v36 }
 0x177   : > { %v5560_v12 = vpop.f32.mrf.mxu0  ;;  %4696 = vmatmul.mubr.msk.f32.gmra.mxu0 %vm646_vm0, %v608_v14  ;;  %v2303_v14 = vmax.f32 %v1565_v61, 0.0 }
 0x178   : > { %4698 = vmatprep.mubr.msk.f32.mxu0 %vm646_vm0, %v609_v11  ;;  %v426_v11 = vld [vmem:[%s4942_s24 + $0x598] sm:$0xff]  ;;  %v2302_v25 = vmax.f32 %v1560_v9, 0.0 }
 0x179   : > { %v5567_v35 = vpop.f32.mrf.mxu0  ;;  %4266 = vmatpush3.xpose.msk.msra.mxu1 %vm2451_vm1, %v2291_v16  ;;  %v1480_v16 = vadd.f32 %v5277_v59, %v5337_v60  ;;  %v618_v36 = vmax.f32 %v426_v11, 0.0  ;;  %v429_v60 = vld [vmem:[%s4942_s24 + $0x5b0] sm:$0xff] }
 0x17a   : > { %4267 = vmatprep.subr.msk.mxu1 %vm2451_vm1, %v2306_v0  ;;  %v619_v0 = vmax.f32 %v427_v5, 0.0  ;;  %v621_v49 = vmax.f32 %v429_v60, 0.0  ;;  %v2283_v5 = vmax.f32 %v1465_v31, 0.0  ;;  %v437_v60 = vld [vmem:[%s4942_s24 + $0x5f0] sm:$0xff] }
 0x17b   : > { %v5574_v43 = vpop.f32.mrf.mxu0  ;;  %4699 = vmatmul.mubr.msk.f32.gmra.mxu0 %vm646_vm0, %v610_v30  ;;  %v1555_v30 = vadd.f32 %v5428_v38, %v5277_v59  ;;  %v2286_v48 = vmax.f32 %v1480_v16, 0.0 }
 0x17c   : > { %4701 = vmatprep.mubr.msk.f32.mxu0 %vm646_vm0, %v611_v27  ;;  %v428_v27 = vld [vmem:[%s4942_s24 + $0x5a8] sm:$0xff] }
 0x17d   : > { %v5581_v53 = vpop.f32.mrf.mxu0  ;;  %4268 = vmatpush3.xpose.msk.msra.mxu1 %vm2451_vm1, %v2290_v2  ;;  %v620_v38 = vmax.f32 %v428_v27, 0.0 }
 0x17e   : > { %4269 = vmatprep.subr.msk.mxu1 %vm2451_vm1, %v2305_v45  ;;  %v1550_v45 = vadd.f32 %v5277_v59, %v5435_v46 }
 0x17f   : > { %v5588_v6 = vpop.f32.mrf.mxu0  ;;  %4702 = vmatmul.mubr.msk.f32.gmra.mxu0 %vm646_vm0, %v612_v29  ;;  %v2301_v29 = vmax.f32 %v1555_v30, 0.0 }
 0x180   : > { %4704 = vmatprep.mubr.msk.f32.mxu0 %vm646_vm0, %v613_v18  ;;  %v430_v18 = vld [vmem:[%s4942_s24 + $0x5b8] sm:$0xff]  ;;  %v2300_v61 = vmax.f32 %v1550_v45, 0.0  ;;  %v629_v45 = vmax.f32 %v437_v60, 0.0 }
 0x181   : > { %v5595_v3 = vpop.f32.mrf.mxu0  ;;  %4270 = vmatpush3.xpose.msk.msra.mxu1 %vm2451_vm1, %v2289_v17  ;;  %v1470_v17 = vadd.f32 %v5277_v59, %v5323_v1  ;;  %v622_v46 = vmax.f32 %v430_v18, 0.0  ;;  %v433_v1 = vld [vmem:[%s4942_s24 + $0x5d0] sm:$0xff] }
 0x182   : > { %4271 = vmatprep.subr.msk.mxu1 %vm2451_vm1, %v2304_v62  ;;  %v623_v62 = vmax.f32 %v431_v55, 0.0  ;;  %v625_v9 = vmax.f32 %v433_v1, 0.0 }
 0x183   : > { %v5602_v8 = vpop.f32.mrf.mxu0  ;;  %4705 = vmatmul.mubr.msk.f32.gmra.mxu0 %vm646_vm0, %v614_v40  ;;  %v1545_v40 = vadd.f32 %v5414_v32, %v5277_v59  ;;  %v2284_v58 = vmax.f32 %v1470_v17, 0.0 }
 0x184   : > { %4707 = vmatprep.mubr.msk.f32.mxu0 %vm646_vm0, %v615_v63  ;;  %v432_v63 = vld [vmem:[%s4942_s24 + $0x5c8] sm:$0xff] }
 0x185   : > { %v5609_v24 = vpop.f32.mrf.mxu0  ;;  %4272 = vmatpush3.xpose.msk.msra.mxu1 %vm2451_vm1, %v2288_v4  ;;  %v624_v32 = vmax.f32 %v432_v63, 0.0 }
 0x186   : > { %4273 = vmatprep.subr.msk.mxu1 %vm2451_vm1, %v2303_v14  ;;  %v1540_v14 = vadd.f32 %v5277_v59, %v5421_v42 }
 0x187   : > { %v5616_v41 = vpop.f32.mrf.mxu0  ;;  %4708 = vmatmul.mubr.msk.f32.gmra.mxu0 %vm646_vm0, %v616_v23  ;;  %v2299_v23 = vmax.f32 %v1545_v40, 0.0 }
 0x188   : > { %4710 = vmatprep.mubr.msk.f32.mxu0 %vm646_vm0, %v617_v10  ;;  %v434_v10 = vld [vmem:[%s4942_s24 + $0x5d8] sm:$0xff]  ;;  %v2298_v30 = vmax.f32 %v1540_v14, 0.0 }
 0x189   : > { %v5623_v28 = vpop.f32.mrf.mxu0  ;;  %4274 = vmatpush3.xpose.msk.msra.mxu1 %vm2451_vm1, %v2287_v39  ;;  %v1460_v39 = vadd.f32 %v5277_v59, %v5309_v54  ;;  %v626_v42 = vmax.f32 %v434_v10, 0.0  ;;  %v1455_v54 = vadd.f32 %v5289_v13, %v5277_v59  ;;  %v1450_v13 = vadd.f32 %v5277_v59, %v5296_v26 }
 0x18a   : > { %4275 = vmatprep.subr.msk.mxu1 %vm2451_vm1, %v2302_v25  ;;  %v627_v25 = vmax.f32 %v435_v33, 0.0 }
 0x18b   : > { %v5630_v2 = vpop.f32.mrf.mxu0  ;;  %4711 = vmatmul.mubr.msk.f32.gmra.mxu0 %vm646_vm0, %v618_v36  ;;  %v1535_v36 = vadd.f32 %v5400_v47, %v5277_v59  ;;  %v2282_v50 = vmax.f32 %v1460_v39, 0.0  ;;  %v2281_v55 = vmax.f32 %v1455_v54, 0.0  ;;  %v2280_v40 = vmax.f32 %v1450_v13, 0.0 }
 0x18c   : > { %4713 = vmatprep.mubr.msk.f32.mxu0 %vm646_vm0, %v619_v0  ;;  %v436_v0 = vld [vmem:[%s4942_s24 + $0x5e8] sm:$0xff] }
 0x18d   : > { %v5637_v51 = vpop.f32.mrf.mxu0  ;;  %4276 = vmatpush3.xpose.msk.msra.mxu1 %vm2451_vm1, %v2286_v48  ;;  %v628_v47 = vmax.f32 %v436_v0, 0.0 }
 0x18e   : > { %4277 = vmatprep.subr.msk.mxu1 %vm2451_vm1, %v2301_v29  ;;  %v1530_v29 = vadd.f32 %v5277_v59, %v5407_v52 }
 0x18f   : > { %v5644_v56 = vpop.f32.mrf.mxu0  ;;  %4714 = vmatmul.mubr.msk.f32.gmra.mxu0 %vm646_vm0, %v620_v38  ;;  %v2297_v38 = vmax.f32 %v1535_v36, 0.0 }
 0x190   : > { %4716 = vmatprep.mubr.msk.f32.mxu0 %vm646_vm0, %v621_v49  ;;  %v438_v49 = vld [vmem:[%s4942_s24 + $0x5f8] sm:$0xff]  ;;  %s232_s24 = scalar_lea.vmem [#allocation3], %s4731_s4 }
 0x191   : > { %v5651_v34 = vpop.f32.mrf.mxu0  ;;  %4278 = vmatpush3.xpose.msk.msra.mxu1 %vm2451_vm1, %v2285_v19  ;;  %v630_v17 = vmax.f32 %v438_v49, 0.0  ;;  %v1660_v49 = vadd.f32 %v5277_v59, %v5581_v53  ;;  %s3565_s26 = sshll.u32 %s232_s24, 4  ;;  %s3566_s26 = int_to_ptr.vmem [resolvable:$true] %s3565_s26 }
 0x192   : > { %4279 = vmatprep.subr.msk.mxu1 %vm2451_vm1, %v2300_v61  ;;  %v1685_v61 = vadd.f32 %v5602_v8, %v5277_v59  ;;  %s4777_s9 = scalar_lea.vmem %s3566_s26, 192  ;;  %p4784_p0 = scmp.lt.s32.totalorder %s3566_s26, %s4782_s12 }
 0x193   : > { %v5658_v4 = vpop.f32.mrf.mxu0  ;;  %4717 = vmatmul.mubr.msk.f32.gmra.mxu0 %vm646_vm0, %v622_v46  ;;  %v2296_v46 = vmax.f32 %v1530_v29, 0.0  ;;  %p4778_p11 = scmp.ne.s32.totalorder %s3566_s26, %s4777_s9  ;;  %p4785_p1 = scmp.lt.s32.totalorder %s4783_s13, %s4777_s9 }
 0x194   : > { %4719 = vmatprep.mubr.msk.f32.mxu0 %vm646_vm0, %v623_v62 }
 0x195   : > { %v5665_v11 = vpop.f32.mrf.mxu0  ;;  %4280 = vmatpush3.xpose.msk.msra.mxu1 %vm2451_vm1, %v2284_v58  ;;  %v2327_v58 = vmax.f32 %v1685_v61, 0.0  ;;  %v1650_v61 = vadd.f32 %v5277_v59, %v5567_v35  ;;  %p4779_p12 = pnand %p4778_p11, %p4910_p5  ;;  %p4786_p2 = por %p4785_p1, %p4784_p0 }
 0x196   : > { %4281 = vmatprep.subr.msk.mxu1 %vm2451_vm1, %v2299_v23 }
 0x197   : > { %v5672_v16 = vpop.f32.mrf.mxu0  ;;  %4720 = vmatmul.mubr.msk.f32.gmra.mxu0 %vm646_vm0, %v624_v32  ;;  %v1680_v32 = vadd.f32 %v5277_v59, %v5609_v24  ;;  %v1675_v24 = vadd.f32 %v5588_v6, %v5277_v59  ;;  %v2320_v35 = vmax.f32 %v1650_v61, 0.0  ;;  %p4780_p13 = pneg %p4779_p12 }
 0x198   : > { %4722 = vmatprep.mubr.msk.f32.mxu0 %vm646_vm0, %v625_v9  ;;  %v5713_v9 = vld [vmem:[%s6271_s3] sm:$0x1] }
 0x199   : > { %v5679_v27 = vpop.f32.mrf.mxu0  ;;  %4282 = vmatpush3.xpose.msk.msra.mxu1 %vm2451_vm1, %v2283_v5  ;;  %v2326_v33 = vmax.f32 %v1680_v32, 0.0  ;;  %p4787_p3 = pnand %p4786_p2, %p4780_p13 }
 0x19a   : > { %4283 = vmatprep.subr.msk.mxu1 %vm2451_vm1, %v2298_v30  ;;  %v2325_v30 = vmax.f32 %v1675_v24, 0.0  ;;  %v1730_v53 = vadd.f32 %v5277_v59, %v5679_v27 }
 0x19b   : > { %v4580_v48 = vpop.f32.mrf.mxu0  ;;  %4723 = vmatmul.mubr.msk.f32.gmra.mxu0 %vm646_vm0, %v626_v42 }
 0x19c   : > { %4725 = vmatprep.mubr.msk.f32.mxu0 %vm646_vm0, %v627_v25  ;;  %v1670_v25 = vadd.f32 %v5277_v59, %v5595_v3  ;;  %v1745_v6 = vadd.f32 %v4580_v48, %v5277_v59 }
 0x19d   : > { %v1739_v18 = vpop.f32.mrf.mxu0  ;;  %4284 = vmatpush3.xpose.msk.msra.mxu1 %vm2451_vm1, %v2282_v50  ;;  %v1665_v50 = vadd.f32 %v5574_v43, %v5277_v59  ;;  %v1735_v43 = vadd.f32 %v5672_v16, %v5277_v59 }
 0x19e   : > { %4285 = vmatprep.subr.msk.mxu1 %vm2451_vm1, %v2297_v38  ;;  %v2339_v29 = vmax.f32 %v1745_v6, 0.0  ;;  %v1740_v3 = vadd.f32 %v5277_v59, %v1739_v18  ;;  %v1655_v18 = vadd.f32 %v5560_v12, %v5277_v59  ;;  %v5778_v12 = vld [vmem:[%s6270_s2] ss:$0 sm:$0xff] }
 0x19f   : > { %v4583_v19 = vpop.f32.mrf.mxu0  ;;  %4726 = vmatmul.mubr.msk.f32.gmra.mxu0 %vm646_vm0, %v628_v47  ;;  %v2324_v47 = vmax.f32 %v1670_v25, 0.0  ;;  %v2323_v48 = vmax.f32 %v1665_v50, 0.0  ;;  %v1725_v27 = vadd.f32 %v5778_v12, %v5658_v4  ;;  %v1630_v6 = vadd.f32 %v5778_v12, %v5539_v22 }
 0x1a0   : > { %4728 = vmatprep.mubr.msk.f32.mxu0 %vm646_vm0, %v629_v45  ;;  %v1755_v14 = vadd.f32 %v4583_v19, %v5277_v59  ;;  %v2338_v13 = vmax.f32 %v1740_v3, 0.0  ;;  %v2321_v16 = vmax.f32 %v1655_v18, 0.0  ;;  %v1700_v22 = vadd.f32 %v5778_v12, %v5637_v51 }
 0x1a1   : > { %v1749_v52 = vpop.f32.mrf.mxu0  ;;  %4286 = vmatpush3.xpose.msk.msra.mxu1 %vm2451_vm1, %v2281_v55  ;;  %v1615_v51 = vadd.f32 %v5778_v12, %v5501_v21 }
 0x1a2   : > { %4287 = vmatprep.subr.msk.mxu1 %vm2451_vm1, %v2296_v46  ;;  %v2341_v39 = vmax.f32 %v1755_v14, 0.0  ;;  %v1750_v42 = vadd.f32 %v5277_v59, %v1749_v52  ;;  %v2337_v52 = vmax.f32 %v1735_v43, 0.0  ;;  %v1640_v14 = vadd.f32 %v5778_v12, %v5553_v15 }
 0x1a3   : > { %v4586_v62 = vpop.f32.mrf.mxu0  ;;  %4729 = vmatmul.mubr.msk.f32.gmra.mxu0 %vm646_vm0, %v630_v17  ;;  %v2322_v17 = vmax.f32 %v1660_v49, 0.0  ;;  %v1710_v15 = vadd.f32 %v5778_v12, %v5651_v34  ;;  %v1625_v34 = vadd.f32 %v5778_v12, %v5519_v44  ;;  %v1620_v43 = vadd.f32 %v5778_v12, %v5525_v20 }
 0x1a4   : > { %v1765_v26 = vadd.f32 %v4586_v62, %v5277_v59  ;;  %v2340_v60 = vmax.f32 %v1750_v42, 0.0  ;;  %v1695_v44 = vadd.f32 %v5778_v12, %v5616_v41  ;;  %v2330_v18 = vmax.f32 %v1700_v22, 0.0 }
 0x1a5   : > { %v1759_v63 = vpop.f32.mrf.mxu0  ;;  %4288 = vmatpush3.xpose.msk.msra.mxu1 %vm2451_vm1, %v2280_v40  ;;  %v2332_v50 = vmax.f32 %v1710_v15, 0.0  ;;  %v1690_v20 = vadd.f32 %v5778_v12, %v5623_v28  ;;  %v2313_v41 = vmax.f32 %v1615_v51, 0.0 }
 0x1a6   : > { %v2343_v1 = vmax.f32 %v1765_v26, 0.0  ;;  %v1760_v31 = vadd.f32 %v5277_v59, %v1759_v63  ;;  %v2336_v26 = vmax.f32 %v1730_v53, 0.0  ;;  %v1645_v59 = vadd.f32 %v5778_v12, %v5546_v7 }
 0x1a7   : > { %v5707_v23 = vpop.f32.mrf.mxu0  ;;  %v1715_v7 = vadd.f32 %v5778_v12, %v5644_v56 }
 0x1a8   : > { %v2342_v8 = vmax.f32 %v1760_v31, 0.0  ;;  %4290 = vmatmul.mubr.msk.f32.vlgmr.msra.gmra.mxu1 %vm2451_vm1, %v5713_v9  ;;  %4291 = vmatprep.subr.msk.mxu1 %vm2451_vm1, %v2343_v1  ;;  %v2335_v31 = vmax.f32 %v1725_v27, 0.0  ;;  %v2319_v4 = vmax.f32 %v1645_v59, 0.0  ;;  %v1610_v27 = vadd.f32 %v5778_v12, %v5509_v37 }
 0x1a9   : > { %v5718_v10 = vpop.f32.mrf.mxu0  ;;  %4292 = vmatpush3.xpose.msk.msra.mxu1 %vm2451_vm1, %v2327_v58  ;;  %4323 = vmatprep.mubr.msk.f32.mxu1 %vm2451_vm1, %v5713_v9  ;;  %v1720_v58 = vadd.f32 %v5778_v12, %v5665_v11  ;;  %v1635_v11 = vadd.f32 %v5778_v12, %v5532_v57  ;;  %v1705_v57 = vadd.f32 %v5778_v12, %v5630_v2  ;;  %v2315_v2 = vmax.f32 %v1625_v34, 0.0 }
 0x1aa   : > { %4293 = vmatprep.subr.msk.mxu1 %vm2451_vm1, %v2342_v8  ;;  %v2328_v59 = vmax.f32 %v1690_v20, 0.0  ;;  %v2312_v21 = vmax.f32 %v1610_v27, 0.0 }
 0x1ab   : > { %v5726_v5 = vpop.f32.mrf.mxu0  ;;  %v2334_v24 = vmax.f32 %v1720_v58, 0.0  ;;  %v2317_v56 = vmax.f32 %v1635_v11, 0.0 }
 0x1ad   : > { %v5729_v36 = vpop.f32.mrf.mxu0  ;;  %4294 = vmatpush3.xpose.msk.msra.mxu1 %vm2451_vm1, %v2326_v33 }
 0x1ae   : > { %4295 = vmatprep.subr.msk.mxu1 %vm2451_vm1, %v2341_v39  ;;  %v2318_v39 = vmax.f32 %v1640_v14, 0.0 }
 0x1af   : > { %v5735_v0 = vpop.f32.mrf.mxu0 }
 0x1b1   : > { %v5738_v54 = vpop.f32.mrf.mxu0  ;;  %4296 = vmatpush3.xpose.msk.msra.mxu1 %vm2451_vm1, %v2325_v30  ;;  %v2333_v30 = vmax.f32 %v1715_v7, 0.0 }
 0x1b2   : > { %4297 = vmatprep.subr.msk.mxu1 %vm2451_vm1, %v2340_v60 }
 0x1b3   : > { %v5744_v38 = vpop.f32.mrf.mxu0 }
 0x1b5   : > { %v5747_v45 = vpop.f32.mrf.mxu0  ;;  %4298 = vmatpush3.xpose.msk.msra.mxu1 %vm2451_vm1, %v2324_v47 }
 0x1b6   : > { %4299 = vmatprep.subr.msk.mxu1 %vm2451_vm1, %v2339_v29  ;;  %v2316_v29 = vmax.f32 %v1630_v6, 0.0 }
 0x1b7   : > { %v5753_v55 = vpop.f32.mrf.mxu0 }
 0x1b9   : > { %v5757_v19 = vpop.f32.mrf.mxu0  ;;  %4300 = vmatpush3.xpose.msk.msra.mxu1 %vm2451_vm1, %v2323_v48  ;;  %v2331_v48 = vmax.f32 %v1705_v57, 0.0 }
 0x1ba   : > { %4301 = vmatprep.subr.msk.mxu1 %vm2451_vm1, %v2338_v13 }
 0x1bb   : > { %v5763_v46 = vpop.f32.mrf.mxu0 }
 0x1bd   : > { %v5767_v40 = vpop.f32.mrf.mxu0  ;;  %4302 = vmatpush3.xpose.msk.msra.mxu1 %vm2451_vm1, %v2322_v17 }
 0x1be   : > { %4303 = vmatprep.subr.msk.mxu1 %vm2451_vm1, %v2337_v52  ;;  %v2314_v52 = vmax.f32 %v1620_v43, 0.0  ;;  %v1825_v43 = vadd.f32 %v5778_v12, %v5763_v46 }
 0x1bf   : > { %v5773_v62 = vpop.f32.mrf.mxu0 }
 0x1c1   : > { %v5782_v63 = vpop.f32.mrf.mxu0  ;;  %4304 = vmatpush3.xpose.msk.msra.mxu1 %vm2451_vm1, %v2321_v16  ;;  %v2329_v16 = vmax.f32 %v1695_v44, 0.0 }
 0x1c2   : > { %4305 = vmatprep.subr.msk.mxu1 %vm2451_vm1, %v2336_v26 }
 0x1c3   : > { %v4610_v1 = vpop.f32.mrf.mxu0 }
 0x1c5   : > { %v5790_v32 = vpop.f32.mrf.mxu0  ;;  %4306 = vmatpush3.xpose.msk.msra.mxu1 %vm2451_vm1, %v2320_v35 }
 0x1c6   : > { %4307 = vmatprep.subr.msk.mxu1 %vm2451_vm1, %v2335_v31  ;;  %v1845_v31 = vadd.f32 %v5778_v12, %v4610_v1 }
 0x1c7   : > { %v5796_v8 = vpop.f32.mrf.mxu0 }
 0x1c8   : > { %v2359_v37 = vmax.f32 %v1845_v31, 0.0  ;;  %v1810_v31 = vadd.f32 %v5778_v12, %v5757_v19 }
 0x1c9   : > { %v5800_v33 = vpop.f32.mrf.mxu0  ;;  %4308 = vmatpush3.xpose.msk.msra.mxu1 %vm2451_vm1, %v2319_v4 }
 0x1ca   : > { %4309 = vmatprep.subr.msk.mxu1 %vm2451_vm1, %v2334_v24  ;;  %v1840_v24 = vadd.f32 %v5778_v12, %v5790_v32  ;;  %v1835_v32 = vadd.f32 %v5778_v12, %v5773_v62 }
 0x1cb   : > { %v5806_v42 = vpop.f32.mrf.mxu0 }
 0x1cc   : > { %v2358_v15 = vmax.f32 %v1840_v24, 0.0  ;;  %v2357_v34 = vmax.f32 %v1835_v32, 0.0 }
 0x1cd   : > { %v5810_v25 = vpop.f32.mrf.mxu0  ;;  %4310 = vmatpush3.xpose.msk.msra.mxu1 %vm2451_vm1, %v2318_v39 }
 0x1ce   : > { %4311 = vmatprep.subr.msk.mxu1 %vm2451_vm1, %v2333_v30 }
 0x1cf   : > { %v5816_v60 = vpop.f32.mrf.mxu0 }
 0x1d1   : > { %v5820_v47 = vpop.f32.mrf.mxu0  ;;  %4312 = vmatpush3.xpose.msk.msra.mxu1 %vm2451_vm1, %v2317_v56 }
 0x1d2   : > { %4313 = vmatprep.subr.msk.mxu1 %vm2451_vm1, %v2332_v50 }
 0x1d3   : > { %v5826_v3 = vpop.f32.mrf.mxu0 }
 0x1d5   : > { %v5830_v49 = vpop.f32.mrf.mxu0  ;;  %4314 = vmatpush3.xpose.msk.msra.mxu1 %vm2451_vm1, %v2316_v29  ;;  %v1830_v29 = vadd.f32 %v5778_v12, %v5782_v63 }
 0x1d6   : > { %4315 = vmatprep.subr.msk.mxu1 %vm2451_vm1, %v2331_v48  ;;  %v1880_v19 = vadd.f32 %v5778_v12, %v5830_v49  ;;  %v1795_v49 = vadd.f32 %v5778_v12, %v5735_v0  ;;  %v1865_v0 = vadd.f32 %v5778_v12, %v5806_v42 }
 0x1d7   : > { %v5836_v13 = vpop.f32.mrf.mxu0  ;;  %v2356_v44 = vmax.f32 %v1830_v29, 0.0 }
 0x1d8   : > { %v1895_v46 = vadd.f32 %v5778_v12, %v5836_v13  ;;  %v2366_v32 = vmax.f32 %v1880_v19, 0.0 }
 0x1d9   : > { %v5840_v17 = vpop.f32.mrf.mxu0  ;;  %4316 = vmatpush3.xpose.msk.msra.mxu1 %vm2451_vm1, %v2315_v2 }
 0x1da   : > { %4317 = vmatprep.subr.msk.mxu1 %vm2451_vm1, %v2330_v18 }
 0x1db   : > { %v4628_v53 = vpop.f32.mrf.mxu0 }
 0x1dc   : > { %v1905_v62 = vadd.f32 %v5778_v12, %v4628_v53  ;;  %v2355_v53 = vmax.f32 %v1825_v43, 0.0 }
 0x1dd   : > { %v1899_v61 = vpop.f32.mrf.mxu0  ;;  %4318 = vmatpush3.xpose.msk.msra.mxu1 %vm2451_vm1, %v2314_v52 }
 0x1de   : > { %4319 = vmatprep.subr.msk.mxu1 %vm2451_vm1, %v2329_v16  ;;  %v2371_v51 = vmax.f32 %v1905_v62, 0.0  ;;  %v1900_v63 = vadd.f32 %v5778_v12, %v1899_v61  ;;  %v1820_v16 = vadd.f32 %v5778_v12, %v5767_v40  ;;  %v1815_v61 = vadd.f32 %v5778_v12, %v5753_v55 }
 0x1df   : > { %v4631_v26 = vpop.f32.mrf.mxu0  ;;  %v1890_v40 = vadd.f32 %v5778_v12, %v5840_v17  ;;  %v1885_v55 = vadd.f32 %v5778_v12, %v5826_v3  ;;  %v1805_v17 = vadd.f32 %v5778_v12, %v5744_v38  ;;  %v1875_v38 = vadd.f32 %v5778_v12, %v5816_v60 }
 0x1e0   : > { %v1915_v39 = vadd.f32 %v5778_v12, %v4631_v26  ;;  %v2354_v26 = vmax.f32 %v1820_v16, 0.0  ;;  %v2353_v13 = vmax.f32 %v1815_v61, 0.0  ;;  %v2349_v60 = vmax.f32 %v1795_v49, 0.0 }
 0x1e1   : > { %v1909_v35 = vpop.f32.mrf.mxu0  ;;  %4320 = vmatpush3.xpose.msk.msra.mxu1 %vm2451_vm1, %v2313_v41  ;;  %v2370_v41 = vmax.f32 %v1900_v63, 0.0  ;;  %v2351_v3 = vmax.f32 %v1805_v17, 0.0  ;;  %v1790_v62 = vadd.f32 %v5778_v12, %v5738_v54  ;;  %v1860_v54 = vadd.f32 %v5778_v12, %v5810_v25 }
 0x1e2   : > { %4321 = vmatprep.subr.msk.mxu1 %vm2451_vm1, %v2328_v59  ;;  %v2373_v6 = vmax.f32 %v1915_v39, 0.0  ;;  %v1910_v57 = vadd.f32 %v5778_v12, %v1909_v35  ;;  %v2369_v35 = vmax.f32 %v1895_v46, 0.0  ;;  %v1800_v39 = vadd.f32 %v5778_v12, %v5747_v45 }
 0x1e3   : > { %v4634_v28 = vpop.f32.mrf.mxu0  ;;  %v1870_v45 = vadd.f32 %v5778_v12, %v5820_v47  ;;  %v1785_v47 = vadd.f32 %v5778_v12, %v5726_v5  ;;  %v1780_v46 = vadd.f32 %v5778_v12, %v5729_v36  ;;  %v1855_v5 = vadd.f32 %v5778_v12, %v5796_v8 }
 0x1e4   : > { %v1925_v58 = vadd.f32 %v5778_v12, %v4634_v28  ;;  %v2372_v22 = vmax.f32 %v1910_v57, 0.0  ;;  %v2362_v61 = vmax.f32 %v1860_v54, 0.0  ;;  %v1775_v25 = vadd.f32 %v5778_v12, %v5707_v23 }
 0x1e5   : > { %v1919_v4 = vpop.f32.mrf.mxu0  ;;  %4322 = vmatpush3.xpose.msk.msra.mxu1 %vm2451_vm1, %v2312_v21  ;;  %v2364_v43 = vmax.f32 %v1870_v45, 0.0  ;;  %v2347_v42 = vmax.f32 %v1785_v47, 0.0  ;;  %v1850_v36 = vadd.f32 %v5778_v12, %v5800_v33 }
 0x1e6   : > { %v2375_v14 = vmax.f32 %v1925_v58, 0.0  ;;  %v1920_v7 = vadd.f32 %v5778_v12, %v1919_v4  ;;  %v2368_v58 = vmax.f32 %v1890_v40, 0.0  ;;  %v2345_v8 = vmax.f32 %v1775_v25, 0.0 }
 0x1e7   : > { %v5860_v11 = vpop.f32.mrf.mxu0  ;;  %v2360_v17 = vmax.f32 %v1850_v36, 0.0 }
 0x1e8   : > { %v2374_v30 = vmax.f32 %v1920_v7, 0.0  ;;  %4324 = vmatmul.mubr.msk.f32.vlgmr.msra.gmra.mxu1 %vm2451_vm1, %v5713_v9  ;;  %4325 = vmatprep.subr.msk.mxu1 %vm2451_vm1, %v2375_v14  ;;  %v2352_v14 = vmax.f32 %v1810_v31, 0.0 }
 0x1e9   : > { %v5866_v1 = vpop.f32.mrf.mxu0  ;;  %4326 = vmatpush3.xpose.msk.msra.mxu1 %vm2451_vm1, %v2359_v37  ;;  %4357 = vmatprep.mubr.msk.f32.mxu1 %vm2451_vm1, %v5713_v9  ;;  %v2367_v37 = vmax.f32 %v1885_v55, 0.0  ;;  %v1770_v55 = vadd.f32 %v5778_v12, %v5718_v10 }
 0x1ea   : > { %4327 = vmatprep.subr.msk.mxu1 %vm2451_vm1, %v2374_v30 }
 0x1eb   : > { %v5874_v56 = vpop.f32.mrf.mxu0  ;;  %v2344_v23 = vmax.f32 %v1770_v55, 0.0 }
 0x1ed   : > { %v5877_v50 = vpop.f32.mrf.mxu0  ;;  %4328 = vmatpush3.xpose.msk.msra.mxu1 %vm2451_vm1, %v2358_v15 }
 0x1ee   : > { %4329 = vmatprep.subr.msk.mxu1 %vm2451_vm1, %v2373_v6  ;;  %v2350_v6 = vmax.f32 %v1800_v39, 0.0 }
 0x1ef   : > { %v5883_v48 = vpop.f32.mrf.mxu0 }
 0x1f1   : > { %v5886_v2 = vpop.f32.mrf.mxu0  ;;  %4330 = vmatpush3.xpose.msk.msra.mxu1 %vm2451_vm1, %v2357_v34  ;;  %v2365_v34 = vmax.f32 %v1875_v38, 0.0 }
 0x1f2   : > { %4331 = vmatprep.subr.msk.mxu1 %vm2451_vm1, %v2372_v22 }
 0x1f3   : > { %v5892_v18 = vpop.f32.mrf.mxu0 }
 0x1f5   : > { %v5895_v52 = vpop.f32.mrf.mxu0  ;;  %4332 = vmatpush3.xpose.msk.msra.mxu1 %vm2451_vm1, %v2356_v44 }
 0x1f6   : > { %4333 = vmatprep.subr.msk.mxu1 %vm2451_vm1, %v2371_v51  ;;  %v2348_v51 = vmax.f32 %v1790_v62, 0.0 }
 0x1f7   : > { %v5901_v20 = vpop.f32.mrf.mxu0 }
 0x1f9   : > { %v5905_v27 = vpop.f32.mrf.mxu0  ;;  %4334 = vmatpush3.xpose.msk.msra.mxu1 %vm2451_vm1, %v2355_v53  ;;  %v2363_v53 = vmax.f32 %v1865_v0, 0.0 }
 0x1fa   : > { %4335 = vmatprep.subr.msk.mxu1 %vm2451_vm1, %v2370_v41 }
 0x1fb   : > { %v5911_v59 = vpop.f32.mrf.mxu0 }
 0x1fd   : > { %v5915_v21 = vpop.f32.mrf.mxu0  ;;  %4336 = vmatpush3.xpose.msk.msra.mxu1 %vm2451_vm1, %v2354_v26 }
 0x1fe   : > { %4337 = vmatprep.subr.msk.mxu1 %vm2451_vm1, %v2369_v35  ;;  %v2346_v35 = vmax.f32 %v1780_v46, 0.0  ;;  %v1985_v46 = vadd.f32 %v5778_v12, %v5911_v59 }
 0x1ff   : > { %v5921_v28 = vpop.f32.mrf.mxu0 }
 0x201   : > { %v5925_v4 = vpop.f32.mrf.mxu0  ;;  %4338 = vmatpush3.xpose.msk.msra.mxu1 %vm2451_vm1, %v2353_v13  ;;  %v2361_v13 = vmax.f32 %v1855_v5, 0.0 }
 0x202   : > { %4339 = vmatprep.subr.msk.mxu1 %vm2451_vm1, %v2368_v58 }
 0x203   : > { %v4658_v7 = vpop.f32.mrf.mxu0 }
 0x205   : > { %v5933_v24 = vpop.f32.mrf.mxu0  ;;  %4340 = vmatpush3.xpose.msk.msra.mxu1 %vm2451_vm1, %v2352_v14 }
 0x206   : > { %4341 = vmatprep.subr.msk.mxu1 %vm2451_vm1, %v2367_v37  ;;  %v2005_v37 = vadd.f32 %v5778_v12, %v4658_v7 }
 0x207   : > { %v5939_v30 = vpop.f32.mrf.mxu0 }
 0x208   : > { %v2391_v10 = vmax.f32 %v2005_v37, 0.0  ;;  %v1970_v37 = vadd.f32 %v5778_v12, %v5905_v27 }
 0x209   : > { %v5943_v15 = vpop.f32.mrf.mxu0  ;;  %4342 = vmatpush3.xpose.msk.msra.mxu1 %vm2451_vm1, %v2351_v3 }
 0x20a   : > { %4343 = vmatprep.subr.msk.mxu1 %vm2451_vm1, %v2366_v32  ;;  %v2000_v32 = vadd.f32 %v5778_v12, %v5933_v24  ;;  %v1995_v24 = vadd.f32 %v5778_v12, %v5921_v28 }
 0x20b   : > { %v5949_v57 = vpop.f32.mrf.mxu0 }
 0x20c   : > { %v2390_v45 = vmax.f32 %v2000_v32, 0.0  ;;  %v2389_v47 = vmax.f32 %v1995_v24, 0.0 }
 0x20d   : > { %v5953_v29 = vpop.f32.mrf.mxu0  ;;  %4344 = vmatpush3.xpose.msk.msra.mxu1 %vm2451_vm1, %v2350_v6 }
 0x20e   : > { %4345 = vmatprep.subr.msk.mxu1 %vm2451_vm1, %v2365_v34 }
 0x20f   : > { %v5959_v22 = vpop.f32.mrf.mxu0 }
 0x211   : > { %v5963_v44 = vpop.f32.mrf.mxu0  ;;  %4346 = vmatpush3.xpose.msk.msra.mxu1 %vm2451_vm1, %v2349_v60 }
 0x212   : > { %4347 = vmatprep.subr.msk.mxu1 %vm2451_vm1, %v2364_v43 }
 0x213   : > { %v5969_v63 = vpop.f32.mrf.mxu0 }
 0x215   : > { %v5973_v16 = vpop.f32.mrf.mxu0  ;;  %4348 = vmatpush3.xpose.msk.msra.mxu1 %vm2451_vm1, %v2348_v51  ;;  %v1990_v51 = vadd.f32 %v5778_v12, %v5925_v4 }
 0x216   : > { %4349 = vmatprep.subr.msk.mxu1 %vm2451_vm1, %v2363_v53  ;;  %v2040_v27 = vadd.f32 %v5778_v12, %v5973_v16  ;;  %v1955_v16 = vadd.f32 %v5778_v12, %v5883_v48  ;;  %v2025_v48 = vadd.f32 %v5778_v12, %v5949_v57 }
 0x217   : > { %v5979_v41 = vpop.f32.mrf.mxu0  ;;  %v2388_v5 = vmax.f32 %v1990_v51, 0.0 }
 0x218   : > { %v2055_v59 = vadd.f32 %v5778_v12, %v5979_v41  ;;  %v2398_v24 = vmax.f32 %v2040_v27, 0.0 }
 0x219   : > { %v5983_v26 = vpop.f32.mrf.mxu0  ;;  %4350 = vmatpush3.xpose.msk.msra.mxu1 %vm2451_vm1, %v2347_v42 }
 0x21a   : > { %4351 = vmatprep.subr.msk.mxu1 %vm2451_vm1, %v2362_v61 }
 0x21b   : > { %v4676_v40 = vpop.f32.mrf.mxu0 }
 0x21c   : > { %v2065_v28 = vadd.f32 %v5778_v12, %v4676_v40  ;;  %v2387_v40 = vmax.f32 %v1985_v46, 0.0 }
 0x21d   : > { %v2059_v31 = vpop.f32.mrf.mxu0  ;;  %4352 = vmatpush3.xpose.msk.msra.mxu1 %vm2451_vm1, %v2346_v35 }
 0x21e   : > { %4353 = vmatprep.subr.msk.mxu1 %vm2451_vm1, %v2361_v13  ;;  %v2403_v25 = vmax.f32 %v2065_v28, 0.0  ;;  %v2060_v4 = vadd.f32 %v5778_v12, %v2059_v31  ;;  %v1980_v13 = vadd.f32 %v5778_v12, %v5915_v21  ;;  %v1975_v31 = vadd.f32 %v5778_v12, %v5901_v20 }
 0x21f   : > { %v4679_v58 = vpop.f32.mrf.mxu0  ;;  %v2050_v21 = vadd.f32 %v5778_v12, %v5983_v26  ;;  %v2045_v20 = vadd.f32 %v5778_v12, %v5969_v63  ;;  %v1965_v26 = vadd.f32 %v5778_v12, %v5892_v18  ;;  %v2035_v18 = vadd.f32 %v5778_v12, %v5959_v22 }
 0x220   : > { %v2075_v6 = vadd.f32 %v5778_v12, %v4679_v58  ;;  %v2386_v58 = vmax.f32 %v1980_v13, 0.0  ;;  %v2385_v41 = vmax.f32 %v1975_v31, 0.0  ;;  %v2381_v22 = vmax.f32 %v1955_v16, 0.0 }
 0x221   : > { %v2069_v14 = vpop.f32.mrf.mxu0  ;;  %4354 = vmatpush3.xpose.msk.msra.mxu1 %vm2451_vm1, %v2345_v8  ;;  %v2402_v8 = vmax.f32 %v2060_v4, 0.0  ;;  %v2383_v63 = vmax.f32 %v1965_v26, 0.0  ;;  %v1950_v28 = vadd.f32 %v5778_v12, %v5886_v2  ;;  %v2020_v2 = vadd.f32 %v5778_v12, %v5953_v29 }
 0x222   : > { %4355 = vmatprep.subr.msk.mxu1 %vm2451_vm1, %v2360_v17  ;;  %v2405_v62 = vmax.f32 %v2075_v6, 0.0  ;;  %v2070_v0 = vadd.f32 %v5778_v12, %v2069_v14  ;;  %v2401_v14 = vmax.f32 %v2055_v59, 0.0  ;;  %v1960_v6 = vadd.f32 %v5778_v12, %v5895_v52 }
 0x223   : > { %v4682_v33 = vpop.f32.mrf.mxu0  ;;  %v2030_v52 = vadd.f32 %v5778_v12, %v5963_v44  ;;  %v1945_v44 = vadd.f32 %v5778_v12, %v5874_v56  ;;  %v1940_v59 = vadd.f32 %v5778_v12, %v5877_v50  ;;  %v2015_v56 = vadd.f32 %v5778_v12, %v5939_v30 }
 0x224   : > { %v2085_v19 = vadd.f32 %v5778_v12, %v4682_v33  ;;  %v2404_v54 = vmax.f32 %v2070_v0, 0.0  ;;  %v2394_v31 = vmax.f32 %v2020_v2, 0.0  ;;  %v1935_v29 = vadd.f32 %v5778_v12, %v5860_v11 }
 0x225   : > { %v2079_v3 = vpop.f32.mrf.mxu0  ;;  %4356 = vmatpush3.xpose.msk.msra.mxu1 %vm2451_vm1, %v2344_v23  ;;  %v2396_v46 = vmax.f32 %v2030_v52, 0.0  ;;  %v2379_v57 = vmax.f32 %v1945_v44, 0.0 }
 0x226   : > { %v2407_v39 = vmax.f32 %v2085_v19, 0.0  ;;  %v2080_v38 = vadd.f32 %v5778_v12, %v2079_v3  ;;  %v2400_v19 = vmax.f32 %v2050_v21, 0.0  ;;  %v2377_v30 = vmax.f32 %v1935_v29, 0.0 }
 0x227   : > { %v6003_v49 = vpop.f32.mrf.mxu0 }
 0x228   : > { %v2406_v34 = vmax.f32 %v2080_v38, 0.0  ;;  %4358 = vmatmul.mubr.msk.f32.vlgmr.msra.gmra.mxu1 %vm2451_vm1, %v5713_v9  ;;  %4359 = vmatprep.subr.msk.mxu1 %vm2451_vm1, %v2407_v39  ;;  %v2384_v39 = vmax.f32 %v1970_v37, 0.0  ;;  %v2010_v37 = vadd.f32 %v5778_v12, %v5943_v15 }
 0x229   : > { %v6009_v7 = vpop.f32.mrf.mxu0  ;;  %4360 = vmatpush3.xpose.msk.msra.mxu1 %vm2451_vm1, %v2391_v10  ;;  %4391 = vmatprep.mubr.msk.f32.mxu1 %vm2451_vm1, %v5713_v9  ;;  %v2399_v10 = vmax.f32 %v2045_v20, 0.0  ;;  %v1930_v20 = vadd.f32 %v5778_v12, %v5866_v1 }
 0x22a   : > { %4361 = vmatprep.subr.msk.mxu1 %vm2451_vm1, %v2406_v34  ;;  %v2392_v26 = vmax.f32 %v2010_v37, 0.0 }
 0x22b   : > { %v6017_v60 = vpop.f32.mrf.mxu0  ;;  %v2376_v11 = vmax.f32 %v1930_v20, 0.0 }
 0x22d   : > { %v6020_v43 = vpop.f32.mrf.mxu0  ;;  %4362 = vmatpush3.xpose.msk.msra.mxu1 %vm2451_vm1, %v2390_v45 }
 0x22e   : > { %4363 = vmatprep.subr.msk.mxu1 %vm2451_vm1, %v2405_v62  ;;  %v2382_v62 = vmax.f32 %v1960_v6, 0.0 }
 0x22f   : > { %v6026_v53 = vpop.f32.mrf.mxu0 }
 0x231   : > { %v6029_v42 = vpop.f32.mrf.mxu0  ;;  %4364 = vmatpush3.xpose.msk.msra.mxu1 %vm2451_vm1, %v2389_v47  ;;  %v2397_v47 = vmax.f32 %v2035_v18, 0.0 }
 0x232   : > { %4365 = vmatprep.subr.msk.mxu1 %vm2451_vm1, %v2404_v54 }
 0x233   : > { %v6035_v61 = vpop.f32.mrf.mxu0 }
 0x235   : > { %v6038_v35 = vpop.f32.mrf.mxu0  ;;  %4366 = vmatpush3.xpose.msk.msra.mxu1 %vm2451_vm1, %v2388_v5 }
 0x236   : > { %4367 = vmatprep.subr.msk.mxu1 %vm2451_vm1, %v2403_v25  ;;  %v2380_v25 = vmax.f32 %v1950_v28, 0.0 }
 0x237   : > { %v6044_v36 = vpop.f32.mrf.mxu0 }
 0x239   : > { %v6048_v55 = vpop.f32.mrf.mxu0  ;;  %4368 = vmatpush3.xpose.msk.msra.mxu1 %vm2451_vm1, %v2387_v40  ;;  %v2395_v40 = vmax.f32 %v2025_v48, 0.0 }
 0x23a   : > { %4369 = vmatprep.subr.msk.mxu1 %vm2451_vm1, %v2402_v8 }
 0x23b   : > { %v6054_v17 = vpop.f32.mrf.mxu0 }
 0x23d   : > { %v6058_v23 = vpop.f32.mrf.mxu0  ;;  %4370 = vmatpush3.xpose.msk.msra.mxu1 %vm2451_vm1, %v2386_v58 }
 0x23e   : > { %4371 = vmatprep.subr.msk.mxu1 %vm2451_vm1, %v2401_v14  ;;  %v2378_v14 = vmax.f32 %v1940_v59, 0.0 }
 0x23f   : > { %v6064_v33 = vpop.f32.mrf.mxu0 }
 0x241   : > { %v6068_v3 = vpop.f32.mrf.mxu0  ;;  %4372 = vmatpush3.xpose.msk.msra.mxu1 %vm2451_vm1, %v2385_v41  ;;  %v2393_v41 = vmax.f32 %v2015_v56, 0.0 }
 0x242   : > { %4373 = vmatprep.subr.msk.mxu1 %vm2451_vm1, %v2400_v19  ;;  %v2150_v28 = vadd.f32 %v5778_v12, %v6068_v3  ;;  %v2140_v3 = vadd.f32 %v5778_v12, %v6058_v23  ;;  %v2130_v23 = vadd.f32 %v5778_v12, %v6048_v55 }
 0x243   : > { %v4706_v38 = vpop.f32.mrf.mxu0 }
 0x244   : > { %v2420_v44 = vmax.f32 %v2150_v28, 0.0  ;;  %v2418_v56 = vmax.f32 %v2140_v3, 0.0 }
 0x245   : > { %v6076_v32 = vpop.f32.mrf.mxu0  ;;  %4374 = vmatpush3.xpose.msk.msra.mxu1 %vm2451_vm1, %v2384_v39 }
 0x246   : > { %4375 = vmatprep.subr.msk.mxu1 %vm2451_vm1, %v2399_v10  ;;  %v2165_v10 = vadd.f32 %v5778_v12, %v4706_v38  ;;  %v2155_v38 = vadd.f32 %v5778_v12, %v6064_v33  ;;  %v2145_v33 = vadd.f32 %v5778_v12, %v6054_v17  ;;  %v2135_v17 = vadd.f32 %v5778_v12, %v6044_v36 }
 0x247   : > { %v6082_v34 = vpop.f32.mrf.mxu0  ;;  %v2125_v36 = vadd.f32 %v5778_v12, %v6035_v61  ;;  %v2115_v61 = vadd.f32 %v5778_v12, %v6026_v53  ;;  %v2105_v53 = vadd.f32 %v5778_v12, %v6017_v60  ;;  %v2095_v60 = vadd.f32 %v5778_v12, %v6003_v49  ;;  %v3097_v49 = vpop.f32.mrf.mxu1 }
 0x248   : > { %v2423_v1 = vmax.f32 %v2165_v10, 0.0  ;;  %v2419_v2 = vmax.f32 %v2145_v33, 0.0 }
 0x249   : > { %v6086_v45 = vpop.f32.mrf.mxu0  ;;  %4376 = vmatpush3.xpose.msk.msra.mxu1 %vm2451_vm1, %v2383_v63  ;;  %v2415_v55 = vmax.f32 %v2125_v36, 0.0 }
 0x24a   : > { %4377 = vmatprep.subr.msk.mxu1 %vm2451_vm1, %v2398_v24  ;;  %v2160_v24 = vadd.f32 %v5778_v12, %v6076_v32 }
 0x24b   : > { %v6092_v0 = vpop.f32.mrf.mxu0 }
 0x24d   : > { %v6096_v51 = vpop.f32.mrf.mxu0  ;;  %4378 = vmatpush3.xpose.msk.msra.mxu1 %vm2451_vm1, %v2382_v62 }
 0x24e   : > { %4379 = vmatprep.subr.msk.mxu1 %vm2451_vm1, %v2397_v47  ;;  %v2422_v47 = vmax.f32 %v2160_v24, 0.0  ;;  %v2180_v10 = vadd.f32 %v5778_v12, %v6096_v51  ;;  %v3099_v24 = vpop.f32.mrf.mxu1 }
 0x24f   : > { %v6102_v54 = vpop.f32.mrf.mxu0 }
 0x251   : > { %v6106_v5 = vpop.f32.mrf.mxu0  ;;  %4380 = vmatpush3.xpose.msk.msra.mxu1 %vm2451_vm1, %v2381_v22  ;;  %v2421_v22 = vmax.f32 %v2155_v38, 0.0 }
 0x252   : > { %4381 = vmatprep.subr.msk.mxu1 %vm2451_vm1, %v2396_v46 }
 0x253   : > { %v6112_v4 = vpop.f32.mrf.mxu0 }
 0x255   : > { %v6116_v13 = vpop.f32.mrf.mxu0  ;;  %4382 = vmatpush3.xpose.msk.msra.mxu1 %vm2451_vm1, %v2380_v25 }
 0x256   : > { %4383 = vmatprep.subr.msk.mxu1 %vm2451_vm1, %v2395_v40  ;;  %v2200_v37 = vadd.f32 %v5778_v12, %v6116_v13 }
 0x257   : > { %v4721_v8 = vpop.f32.mrf.mxu0 }
 0x259   : > { %v2209_v58 = vpop.f32.mrf.mxu0  ;;  %4384 = vmatpush3.xpose.msk.msra.mxu1 %vm2451_vm1, %v2379_v57  ;;  %v2215_v57 = vadd.f32 %v5778_v12, %v4721_v8  ;;  %v2205_v8 = vadd.f32 %v5778_v12, %v6112_v4  ;;  %v2120_v4 = vadd.f32 %v5778_v12, %v6038_v35  ;;  %v2413_v35 = vmax.f32 %v2115_v61, 0.0 }
 0x25a   : > { %4385 = vmatprep.subr.msk.mxu1 %vm2451_vm1, %v2394_v31  ;;  %v2210_v29 = vadd.f32 %v5778_v12, %v2209_v58  ;;  %v2416_v58 = vmax.f32 %v2130_v23, 0.0 }
 0x25b   : > { %v4724_v21 = vpop.f32.mrf.mxu0  ;;  %v2433_v31 = vmax.f32 %v2215_v57, 0.0  ;;  %v2414_v13 = vmax.f32 %v2120_v4, 0.0 }
 0x25c   : > { %v2225_v48 = vadd.f32 %v5778_v12, %v4724_v21  ;;  %v2432_v21 = vmax.f32 %v2210_v29, 0.0 }
 0x25d   : > { %v2219_v50 = vpop.f32.mrf.mxu0  ;;  %4386 = vmatpush3.xpose.msk.msra.mxu1 %vm2451_vm1, %v2378_v14  ;;  %v2417_v14 = vmax.f32 %v2135_v17, 0.0 }
 0x25e   : > { %4387 = vmatprep.subr.msk.mxu1 %vm2451_vm1, %v2393_v41  ;;  %v2435_v25 = vmax.f32 %v2225_v48, 0.0  ;;  %v2220_v40 = vadd.f32 %v5778_v12, %v2219_v50  ;;  %v2431_v41 = vmax.f32 %v2205_v8, 0.0  ;;  %v2195_v50 = vadd.f32 %v5778_v12, %v6102_v54 }
 0x25f   : > { %v4727_v19 = vpop.f32.mrf.mxu0  ;;  %v2110_v54 = vadd.f32 %v5778_v12, %v6029_v42  ;;  %v2411_v42 = vmax.f32 %v2105_v53, 0.0 }
 0x260   : > { %v2235_v16 = vadd.f32 %v5778_v12, %v4727_v19  ;;  %v2434_v59 = vmax.f32 %v2220_v40, 0.0  ;;  %v2429_v20 = vmax.f32 %v2195_v50, 0.0  ;;  %v2190_v19 = vadd.f32 %v5778_v12, %v6106_v5 }
 0x261   : > { %v2229_v39 = vpop.f32.mrf.mxu0  ;;  %4388 = vmatpush3.xpose.msk.msra.mxu1 %vm2451_vm1, %v2377_v30  ;;  %v2430_v30 = vmax.f32 %v2200_v37, 0.0  ;;  %v2412_v5 = vmax.f32 %v2110_v54, 0.0 }
 0x262   : > { %4389 = vmatprep.subr.msk.mxu1 %vm2451_vm1, %v2392_v26  ;;  %v2437_v32 = vmax.f32 %v2235_v16, 0.0  ;;  %v2230_v52 = vadd.f32 %v5778_v12, %v2229_v39  ;;  %v2185_v26 = vadd.f32 %v5778_v12, %v6092_v0  ;;  %v2428_v39 = vmax.f32 %v2190_v19, 0.0 }
 0x263   : > { %v4730_v15 = vpop.f32.mrf.mxu0  ;;  %v2100_v0 = vadd.f32 %v5778_v12, %v6020_v43  ;;  %v2409_v43 = vmax.f32 %v2095_v60, 0.0 }
 0x264   : > { %v2245_v27 = vadd.f32 %v5778_v12, %v4730_v15  ;;  %v2436_v46 = vmax.f32 %v2230_v52, 0.0  ;;  %v2175_v15 = vadd.f32 %v5778_v12, %v6082_v34  ;;  %v2090_v34 = vadd.f32 %v5778_v12, %v6009_v7 }
 0x265   : > { %v2239_v63 = vpop.f32.mrf.mxu0  ;;  %4390 = vmatpush3.xpose.msk.msra.mxu1 %vm2451_vm1, %v2376_v11  ;;  %v2427_v11 = vmax.f32 %v2185_v26, 0.0  ;;  %v2410_v51 = vmax.f32 %v2100_v0, 0.0  ;;  %v4840_v7 = vmov 1966171168  }
 0x266   : > { %v2439_v6 = vmax.f32 %v2245_v27, 0.0  ;;  %v2240_v18 = vadd.f32 %v5778_v12, %v2239_v63  ;;  %v2426_v27 = vmax.f32 %v2180_v10, 0.0  ;;  %v2425_v63 = vmax.f32 %v2175_v15, 0.0 }
 0x267   : > { %v3474_v52 = vunpack.c.l.s4 %v4840_v7 }
 0x268   : > { %v2438_v62 = vmax.f32 %v2240_v18, 0.0  ;;  %4392 = vmatmul.mubr.msk.f32.vlgmr.msra.gmra.mxu1 %vm2451_vm1, %v5713_v9  ;;  %4393 = vmatprep.subr.msk.mxu1 %vm2451_vm1, %v2439_v6  ;;  %v2170_v6 = vadd.f32 %v5778_v12, %v6086_v45  ;;  %v2447_v45 = vlaneseq }
 0x269   : > { %4394 = vmatpush3.xpose.msk.msra.mxu1 %vm2451_vm1, %v2423_v1  ;;  %4425 = vmatprep.mubr.msk.f32.mxu1 %vm2451_vm1, %v5713_v9  ;;  %v2408_v1 = vmax.f32 %v2090_v34, 0.0  ;;  %v3475_v33 = vunpack.c.0.s8 %v3474_v52 }
 0x26a   : > { %4395 = vmatprep.subr.msk.mxu1 %vm2451_vm1, %v2438_v62  ;;  %v2424_v18 = vmax.f32 %v2170_v6, 0.0  ;;  %v2448_v16 = vshrl.u32 %v2447_v45, 7  ;;  %v3168_v62 = vpop.f32.mrf.mxu1  ;;  %vm3547_vm2 = vcmp.lt.s32.totalorder %v2447_v45, 512 }
 0x26c   : > { %v2449_v38 = vsub.s32 0, %v2448_v16  ;;  %v3478_v57 = vsub.s32 %v3475_v33, %v2448_v16 }
 0x26d   : > { %4396 = vmatpush3.xpose.msk.msra.mxu1 %vm2451_vm1, %v2422_v47  ;;  %v2445_v47 = vpop.permute.xlu0 %2444 }
 0x26e   : > { %4397 = vmatprep.subr.msk.mxu1 %vm2451_vm1, %v2437_v32  ;;  %v3170_v32 = vpop.f32.mrf.mxu1 }
 0x271   : > { %4398 = vmatpush3.xpose.msk.msra.mxu1 %vm2451_vm1, %v2421_v22  ;;  %v2450_v22 = vrot.slane %v2445_v47, %v2449_v38 }
 0x272   : > { %4399 = vmatprep.subr.msk.mxu1 %vm2451_vm1, %v2436_v46 }
 0x273   : > { %v3169_v28 = vadd.f32 %v3168_v62, %v2450_v22  ;;  %v3171_v48 = vadd.f32 %v3170_v32, %v2450_v22 }
 0x275   : > { %4400 = vmatpush3.xpose.msk.msra.mxu1 %vm2451_vm1, %v2420_v44  ;;  %v3098_v44 = vadd.f32 %v3097_v49, %v2450_v22 }
 0x276   : > { %4401 = vmatprep.subr.msk.mxu1 %vm2451_vm1, %v2435_v25  ;;  %v3100_v25 = vadd.f32 %v3099_v24, %v2450_v22 }
 0x279   : > { %4402 = vmatpush3.xpose.msk.msra.mxu1 %vm2451_vm1, %v2419_v2 }
 0x27a   : > { %4403 = vmatprep.subr.msk.mxu1 %vm2451_vm1, %v2434_v59  ;;  %v3469_v59 = vcombine.low %v3098_v44, %v3100_v25 }
 0x27c   : > { %v3479_v23 = vrot.slane %v3469_v59, %v3478_v57 }
 0x27d   : > { %4404 = vmatpush3.xpose.msk.msra.mxu1 %vm2451_vm1, %v2418_v56 }
 0x27e   : > { %4405 = vmatprep.subr.msk.mxu1 %vm2451_vm1, %v2433_v31 }
 0x281   : > { %4406 = vmatpush3.xpose.msk.msra.mxu1 %vm2451_vm1, %v2417_v14 }
 0x282   : > { %4407 = vmatprep.subr.msk.mxu1 %vm2451_vm1, %v2432_v21 }
 0x285   : > { %4408 = vmatpush3.xpose.msk.msra.mxu1 %vm2451_vm1, %v2416_v58 }
 0x286   : > { %4409 = vmatprep.subr.msk.mxu1 %vm2451_vm1, %v2431_v41 }
 0x289   : > { %4410 = vmatpush3.xpose.msk.msra.mxu1 %vm2451_vm1, %v2415_v55 }
 0x28a   : > { %4411 = vmatprep.subr.msk.mxu1 %vm2451_vm1, %v2430_v30 }
 0x28d   : > { %4412 = vmatpush3.xpose.msk.msra.mxu1 %vm2451_vm1, %v2414_v13 }
 0x28e   : > { %4413 = vmatprep.subr.msk.mxu1 %vm2451_vm1, %v2429_v20 }
 0x291   : > { %4414 = vmatpush3.xpose.msk.msra.mxu1 %vm2451_vm1, %v2413_v35 }
 0x292   : > { %4415 = vmatprep.subr.msk.mxu1 %vm2451_vm1, %v2428_v39 }
 0x295   : > { %4416 = vmatpush3.xpose.msk.msra.mxu1 %vm2451_vm1, %v2412_v5 }
 0x296   : > { %4417 = vmatprep.subr.msk.mxu1 %vm2451_vm1, %v2427_v11 }
 0x299   : > { %4418 = vmatpush3.xpose.msk.msra.mxu1 %vm2451_vm1, %v2411_v42 }
 0x29a   : > { %4419 = vmatprep.subr.msk.mxu1 %vm2451_vm1, %v2426_v27 }
 0x29d   : > { %4420 = vmatpush3.xpose.msk.msra.mxu1 %vm2451_vm1, %v2410_v51 }
 0x29e   : > { %4421 = vmatprep.subr.msk.mxu1 %vm2451_vm1, %v2425_v63 }
 0x2a1   : > { %4422 = vmatpush3.xpose.msk.msra.mxu1 %vm2451_vm1, %v2409_v43 }
 0x2a2   : > { %4423 = vmatprep.subr.msk.mxu1 %vm2451_vm1, %v2424_v18 }
 0x2a5   : > { %4424 = vmatpush3.xpose.msk.msra.mxu1 %vm2451_vm1, %v2408_v1 }
 0x2a8   : > { %4426 = vmatmul.mubr.msk.f32.vlgmr.msra.gmra.mxu1 %vm2451_vm1, %v5713_v9  ;;  %v3239_v12 = vpop.f32.mrf.mxu1  ;;  %v3470_v9 = vcombine.low %v3169_v28, %v3171_v48 }
 0x2a9   : > { %v3240_v40 = vadd.f32 %v3239_v12, %v2450_v22 }
 0x2aa   : > { %v3241_v46 = vpop.f32.mrf.mxu1  ;;  %v3486_v31 = vrot.slane %v3470_v9, %v3478_v57 }
 0x2ab   : > { %v3242_v2 = vadd.f32 %v3241_v46, %v2450_v22 }
 0x2ac   : > { %v3501_v21 = vcombine.low %v3479_v23, %v3486_v31 }
 0x2ad   : > { %v3471_v29 = vcombine.low %v3240_v40, %v3242_v2 }
 0x2ae   : > { %v3509_v37 = vrot.slane %v3501_v21, %v3478_v57 }
 0x2af   : > { %v3493_v36 = vrot.slane %v3471_v29, %v3478_v57 }
 0x2e8   : > { %v3310_v3 = vpop.f32.mrf.mxu1 }
 0x2e9   : > { %v3311_v17 = vadd.f32 %v3310_v3, %v2450_v22 }
 0x2ea   : > { %v3312_v56 = vpop.f32.mrf.mxu1 }
 0x2eb   : > { %v3313_v14 = vadd.f32 %v3312_v56, %v2450_v22 }
 0x2ed   : > { %v3472_v8 = vcombine.low %v3311_v17, %v3313_v14 }
 0x2ef   : > { %v3500_v58 = vrot.slane %v3472_v8, %v3478_v57 }
 0x2f1   : > { %v3502_v41 = vcombine.low %v3493_v36, %v3500_v58 }
 0x2f3   : > { %v3516_v55 = vrot.slane %v3502_v41, %v3478_v57 }
 0x2f5   : > { %v3517_v4 = vcombine.low %v3509_v37, %v3516_v55 }
 0x2f7   : > { %3544 = vst [vmem:[%s232_s24] sm:$0xff] %v3517_v4 }
 0x328   : > { %v3381_v50 = vpop.f32.mrf.mxu1 }
 0x329   : > { %v3382_v61 = vadd.f32 %v3381_v50, %v2450_v22 }
 0x32a   : > { %v3383_v30 = vpop.f32.mrf.mxu1 }
 0x32b   : > { %v3384_v13 = vadd.f32 %v3383_v30, %v2450_v22 }
 0x32d   : > { %v3518_v35 = vcombine.low %v3382_v61, %v3384_v13 }
 0x32f   : > { %v3526_v53 = vrot.slane %v3518_v35, %v3478_v57 }
 0x368   : > { %v3452_v20 = vpop.f32.mrf.mxu1 }
 0x369   : > { %v3453_v54 = vadd.f32 %v3452_v20, %v2450_v22 }
 0x36a   : > { %v3454_v19 = vpop.f32.mrf.mxu1 }
 0x36b   : > { %v3455_v26 = vadd.f32 %v3454_v19, %v2450_v22 }
 0x36d   : > { %v3519_v39 = vcombine.low %v3453_v54, %v3455_v26 }
 0x36f   : > { %v3533_v5 = vrot.slane %v3519_v39, %v3478_v57 }
 0x371   : > { %v3534_v11 = vcombine.low %v3526_v53, %v3533_v5 }
 0x373   : > { %v3541_v10 = vrot.slane %v3534_v11, %v3478_v57 }
 0x375   : > { %3549 = vst.msk [vmem:[%s232_s24 + $0x8] sm:$0xf] %vm3547_vm2, %v3541_v10 }
 0x376   : > { %4790 = shalt.err (!%p4787_p3)
}
 0x377   : > { %s4791_s14 = scalar_lea.hbm %s3563_s7, 192  ;;  %s4795_s16 = scalar_lea.hbm %s6273_s5, 384 }
 0x378   : > { %p4792_p4 = scmp.ne.s32.totalorder %s3563_s7, %s4791_s14  ;;  %p4796_p9 = scmp.lt.s32.totalorder %s3563_s7, %s6273_s5 }
 0x379   : > { %p4797_p10 = scmp.lt.s32.totalorder %s4795_s16, %s4791_s14 }
 0x37a   : > { %p4793_p7 = pnand %p4792_p4, %p4910_p5 }
 0x37b   : > { %p4798_p11 = por %p4797_p10, %p4796_p9 }
 0x37c   : > { %p4794_p8 = pneg %p4793_p7 }
 0x37e   : > { %p4799_p12 = pnand %p4798_p11, %p4794_p8 }
 0x380   : > { %4802 = shalt.err (!%p4799_p12)
}
 0x381   : > { %4733 = dma.vmem_to_hbm [thread:$0]  (%p4910_p5), %s3566_s26, 192, %s3563_s7, %s3551_s8  }
 0x382 PF: > { %p4739_p13 = scmp.ge.s32.totalorder %s4837_s23, 2  ;;  %s3577_s19 = sand.u32 1, %s4825_s20  }
 0x383   : > { %s3578_s4 = scalar_lea.sflag [#allocation4], %s3577_s19 }
 0x384   : > { %p4736_p0 = pnand %p4739_p13, %p4914_p6 }
 0x386   : > { %p4737_p1 = pneg %p4736_p0 }
 0x388   : > { %4820 = dma.done.wait (%p4737_p1), %s3578_s4, 192  }
 0x389   : > { %4822 = vsyncadd (%p4737_p1), %s3578_s4, 4294967104  ;;  %p17_p2 = scmp.ge.s32.totalorder %s4898_s25, 4   ;;  %s6276_s20 = smov %s4829_s21 }
 0x38a   : > { %s6277_s21 = smov %s4833_s22  ;;  %s6278_s22 = smov %s4908_s28 }
 0x38b   : > { %s6279_s23 = smov %s4898_s25  ;;  %19 = sbr.rel (!%p17_p2) target bundleno = 6 (0x6), region = 75 }
 0x390   :  { %3583 = vsyncpa [#allocation4], 1 }
 0x391   :  { %3585 = vsyncpa [#allocation4 + $0x1], 1 }

</bundles_post_ra>
